<compile_context>
chip_gen: v5e
topology: v5e:2x2
jax: 0.10.0
libtpu: 0.0.40
codegen_flags: <defaults>
</compile_context>

<pallas_src>
import functools

import jax
import jax.numpy as jnp
from jax.experimental import pallas as pl
from jax.experimental.pallas import tpu as pltpu


def _mix32(x):
    # lowbias32-style 32-bit integer finalizer (good avalanche, cheap).
    x = x ^ (x >> jnp.uint32(16))
    x = x * jnp.uint32(0x7FEB352D)
    x = x ^ (x >> jnp.uint32(15))
    x = x * jnp.uint32(0x846CA68B)
    x = x ^ (x >> jnp.uint32(16))
    return x


def _add_softmax_dropout_kernel(seed_ref, x_ref, bias_ref, o_ref,
                                *, p: float, training: bool,
                                tile_rows: int, n_cols: int):
    # x_ref: (tile_rows, Sk)  bias_ref: (1, Sk)  o_ref: (tile_rows, Sk)
    x = x_ref[...].astype(jnp.float32)
    bias = bias_ref[...].astype(jnp.float32)          # (1, Sk) -> broadcast over rows
    z = x + bias

    # numerically stable softmax over the last dim
    m = jnp.max(z, axis=-1, keepdims=True)
    e = jnp.exp(z - m)
    s = jnp.sum(e, axis=-1, keepdims=True)
    soft = e * (1.0 / s)                               # per-row scalar reciprocal

    if training and p > 0.0:
        shape = soft.shape
        # Global element index -> tiling-invariant dropout mask.
        base_row = pl.program_id(0) * tile_rows
        row = jax.lax.broadcasted_iota(jnp.int32, shape, 0) + base_row
        col = jax.lax.broadcasted_iota(jnp.int32, shape, 1)
        idx = (row * n_cols + col).astype(jnp.uint32)
        seed_u = seed_ref[0].astype(jnp.uint32)
        h = _mix32(idx ^ _mix32(seed_u))
        # Top 24 bits as an integer uniform; drop iff below p * 2^24.
        hi24 = (h >> jnp.uint32(8)).astype(jnp.int32)
        drop_thresh = jnp.int32(int(round(p * (1 << 24))))
        keep = hi24 >= drop_thresh
        scale = jnp.float32(1.0 / (1.0 - p))
        soft = jnp.where(keep, soft * scale, jnp.float32(0.0))

    o_ref[...] = soft.astype(o_ref.dtype)


def _pick_tile_rows(rows: int, requested: int) -> int:
    """Largest multiple-of-8 divisor of `rows` that is <= requested (else full rows)."""
    if rows % 8 != 0:
        return rows  # single full-extent block is always a legal block shape
    cap = max(8, min(requested, rows))
    cap -= cap % 8
    for d in range(cap, 7, -8):
        if rows % d == 0:
            return d
    return rows


def add_softmax_dropout(x, bias, seed, *, p=0.1, training=True, tile_rows=1152):
    """x: (B, H, Sq, Sk), bias: (1, 1, 1, Sk)."""
    B, H, Sq, Sk = x.shape
    rows = B * H * Sq

    # Keep at least 2 grid steps when possible so DMA/compute overlap (and
    # megacore sharding on v7x) have something to work with.
    cap = min(tile_rows, max(rows // 2, 1))
    tr = _pick_tile_rows(rows, cap)
    grid = rows // tr

    x2 = x.reshape(rows, Sk)
    b2 = bias.reshape(1, Sk)
    seed_arr = jnp.asarray([seed], dtype=jnp.int32)

    kernel = functools.partial(_add_softmax_dropout_kernel,
                               p=float(p), training=bool(training),
                               tile_rows=tr, n_cols=Sk)

    out2 = pl.pallas_call(
        kernel,
        out_shape=jax.ShapeDtypeStruct((rows, Sk), x.dtype),
        grid_spec=pltpu.PrefetchScalarGridSpec(
            num_scalar_prefetch=1,
            grid=(grid,),
            in_specs=[
                pl.BlockSpec((tr, Sk), lambda i, seed: (i, 0)),
                pl.BlockSpec((1, Sk), lambda i, seed: (0, 0)),
            ],
            out_specs=pl.BlockSpec((tr, Sk), lambda i, seed: (i, 0)),
        ),
        compiler_params=pltpu.CompilerParams(
            # Tiles are fully independent (counter-based PRNG), so the grid can
            # be sharded across TensorCores on v7x.
            dimension_semantics=("parallel",),
        ),
    )(seed_arr, x2, b2)

    return out2.reshape(B, H, Sq, Sk)


if __name__ == "__main__":
    # Small shapes consistent with the module: [B=1, heads=4, seq=128, seq=128]
    key = jax.random.PRNGKey(0)
    kx, kb = jax.random.split(key)
    x = jax.random.normal(kx, (1, 4, 128, 128), dtype=jnp.float32)        # ~ x511
    bias = jax.random.uniform(kb, (1, 1, 1, 128), dtype=jnp.float32)      # ~ _tensor_constant20

    out = add_softmax_dropout(x, bias, seed=0, p=0.1, training=True)
    out = jax.block_until_ready(out)
    assert out.shape == x.shape and out.dtype == x.dtype

    # eval-mode check against pure-JAX softmax reference
    ref = jax.nn.softmax(x + bias, axis=-1)
    out_eval = jax.block_until_ready(
        add_softmax_dropout(x, bias, seed=0, p=0.1, training=False))
    assert jnp.allclose(out_eval, ref, atol=1e-5, rtol=1e-5)

    # training-mode sanity: kept entries equal ref / (1 - p), dropped entries are 0
    kept = out != 0.0
    assert jnp.allclose(jnp.where(kept, out, 0.0),
                        jnp.where(kept, ref / (1.0 - 0.1), 0.0),
                        atol=1e-5, rtol=1e-5)

    print("KERNEL_OK")
</pallas_src>

<mosaic_0001>
module attributes {stable_mosaic.version = 11 : i64} {
  func.func @_add_softmax_dropout_kernel(%arg0: i32, %arg1: memref<1xi32, #tpu.memory_space<smem>>, %arg2: memref<256x128xf32, #tpu.memory_space<vmem>>, %arg3: memref<1x128xf32, #tpu.memory_space<vmem>>, %arg4: memref<256x128xf32, #tpu.memory_space<vmem>>) attributes {dimension_semantics = [#tpu.dimension_semantics<parallel>], iteration_bounds = array<i64: 2>, scalar_prefetch = 1 : i64, scratch_operands = 0 : i64, tpu.core_type = #tpu.core_type<tc>, window_params = [{transform_indices = @transform_0, window_bounds = array<i64: 256, 128>}, {pipeline_mode = #tpu.pipeline_mode<synchronous>, transform_indices = @transform_1, window_bounds = array<i64: 1, 128>}, {transform_indices = @transform_2, window_bounds = array<i64: 256, 128>}]} {
    %c0 = arith.constant 0 : index
    %c0_0 = arith.constant 0 : index
    %0 = vector.load %arg2[%c0, %c0_0] : memref<256x128xf32, #tpu.memory_space<vmem>>, vector<256x128xf32>
    %c0_1 = arith.constant 0 : index
    %c0_2 = arith.constant 0 : index
    %1 = vector.load %arg3[%c0_1, %c0_2] : memref<1x128xf32, #tpu.memory_space<vmem>>, vector<1x128xf32>
    %2 = vector.broadcast %1 : vector<1x128xf32> to vector<256x128xf32>
    %3 = arith.addf %0, %2 : vector<256x128xf32>
    %cst = arith.constant dense<0xFF800000> : vector<256xf32>
    %4 = vector.multi_reduction <maximumf>, %3, %cst [1] : vector<256x128xf32> to vector<256xf32>
    %5 = vector.shape_cast %4 : vector<256xf32> to vector<256x1xf32>
    %6 = vector.broadcast %5 : vector<256x1xf32> to vector<256x128xf32>
    %7 = arith.subf %3, %6 : vector<256x128xf32>
    %8 = math.exp %7 : vector<256x128xf32>
    %cst_3 = arith.constant dense<0.000000e+00> : vector<256xf32>
    %9 = vector.multi_reduction <add>, %8, %cst_3 [1] : vector<256x128xf32> to vector<256xf32>
    %10 = vector.shape_cast %9 : vector<256xf32> to vector<256x1xf32>
    %cst_4 = arith.constant 1.000000e+00 : f32
    %11 = vector.broadcast %cst_4 : f32 to vector<256x1xf32>
    %12 = arith.divf %11, %10 : vector<256x1xf32>
    %13 = vector.broadcast %12 : vector<256x1xf32> to vector<256x128xf32>
    %14 = arith.mulf %8, %13 : vector<256x128xf32>
    %c256_i32 = arith.constant 256 : i32
    %15 = arith.muli %arg0, %c256_i32 : i32
    %16 = tpu.iota {dimensions = array<i32: 0>} : vector<256x128xi32>
    %17 = vector.broadcast %15 : i32 to vector<256x128xi32>
    %18 = arith.addi %16, %17 : vector<256x128xi32>
    %19 = tpu.iota {dimensions = array<i32: 1>} : vector<256x128xi32>
    %c128_i32 = arith.constant 128 : i32
    %20 = vector.broadcast %c128_i32 : i32 to vector<256x128xi32>
    %21 = arith.muli %18, %20 : vector<256x128xi32>
    %22 = arith.addi %21, %19 : vector<256x128xi32>
    %c0_5 = arith.constant 0 : index
    %23 = memref.load %arg1[%c0_5] : memref<1xi32, #tpu.memory_space<smem>>
    %c16_i32 = arith.constant 16 : i32
    %24 = arith.shrui %23, %c16_i32 : i32
    %25 = arith.xori %23, %24 : i32
    %c2146121005_i32 = arith.constant 2146121005 : i32
    %26 = arith.muli %25, %c2146121005_i32 : i32
    %c15_i32 = arith.constant 15 : i32
    %27 = arith.shrui %26, %c15_i32 : i32
    %28 = arith.xori %26, %27 : i32
    %c-2073254261_i32 = arith.constant -2073254261 : i32
    %29 = arith.muli %28, %c-2073254261_i32 : i32
    %c16_i32_6 = arith.constant 16 : i32
    %30 = arith.shrui %29, %c16_i32_6 : i32
    %31 = arith.xori %29, %30 : i32
    %32 = vector.broadcast %31 : i32 to vector<256x128xi32>
    %33 = arith.xori %22, %32 : vector<256x128xi32>
    %c16_i32_7 = arith.constant 16 : i32
    %34 = vector.broadcast %c16_i32_7 : i32 to vector<256x128xi32>
    %35 = arith.shrui %33, %34 : vector<256x128xi32>
    %36 = arith.xori %33, %35 : vector<256x128xi32>
    %c2146121005_i32_8 = arith.constant 2146121005 : i32
    %37 = vector.broadcast %c2146121005_i32_8 : i32 to vector<256x128xi32>
    %38 = arith.muli %36, %37 : vector<256x128xi32>
    %c15_i32_9 = arith.constant 15 : i32
    %39 = vector.broadcast %c15_i32_9 : i32 to vector<256x128xi32>
    %40 = arith.shrui %38, %39 : vector<256x128xi32>
    %41 = arith.xori %38, %40 : vector<256x128xi32>
    %c-2073254261_i32_10 = arith.constant -2073254261 : i32
    %42 = vector.broadcast %c-2073254261_i32_10 : i32 to vector<256x128xi32>
    %43 = arith.muli %41, %42 : vector<256x128xi32>
    %c16_i32_11 = arith.constant 16 : i32
    %44 = vector.broadcast %c16_i32_11 : i32 to vector<256x128xi32>
    %45 = arith.shrui %43, %44 : vector<256x128xi32>
    %46 = arith.xori %43, %45 : vector<256x128xi32>
    %c8_i32 = arith.constant 8 : i32
    %47 = vector.broadcast %c8_i32 : i32 to vector<256x128xi32>
    %48 = arith.shrui %46, %47 : vector<256x128xi32>
    %c1677722_i32 = arith.constant 1677722 : i32
    %49 = vector.broadcast %c1677722_i32 : i32 to vector<256x128xi32>
    %50 = arith.cmpi sge, %48, %49 : vector<256x128xi32>
    %cst_12 = arith.constant 1.11111116 : f32
    %51 = vector.broadcast %cst_12 : f32 to vector<256x128xf32>
    %52 = arith.mulf %14, %51 : vector<256x128xf32>
    %cst_13 = arith.constant 0.000000e+00 : f32
    %53 = vector.broadcast %cst_13 : f32 to vector<256x128xf32>
    %54 = arith.select %50, %52, %53 : vector<256x128xi1>, vector<256x128xf32>
    %c0_14 = arith.constant 0 : index
    %c0_15 = arith.constant 0 : index
    %55 = vector.load %arg4[%c0_14, %c0_15] : memref<256x128xf32, #tpu.memory_space<vmem>>, vector<256x128xf32>
    tpu.vector_store %arg4[%c0_14, %c0_15], %54 {strides = array<i32>} : memref<256x128xf32, #tpu.memory_space<vmem>>, vector<256x128xf32>,
    return
  }
  func.func @transform_0(%arg0: i32, %arg1: memref<1xi32, #tpu.memory_space<smem>>) -> (i32, i32) {
    %c0_i32 = arith.constant 0 : i32
    %c0_i32_0 = arith.constant 0 : i32
    return %arg0, %c0_i32 : i32, i32
  }
  func.func @transform_1(%arg0: i32, %arg1: memref<1xi32, #tpu.memory_space<smem>>) -> (i32, i32) {
    %c0_i32 = arith.constant 0 : i32
    %c0_i32_0 = arith.constant 0 : i32
    %c0_i32_1 = arith.constant 0 : i32
    return %c0_i32, %c0_i32_0 : i32, i32
  }
  func.func @transform_2(%arg0: i32, %arg1: memref<1xi32, #tpu.memory_space<smem>>) -> (i32, i32) {
    %c0_i32 = arith.constant 0 : i32
    %c0_i32_0 = arith.constant 0 : i32
    return %arg0, %c0_i32 : i32, i32
  }
}

</mosaic_0001>

<bundles_post_ra>
// kernel: tpu_custom_call.1
= control target key start
LH: loop header
LB: loop body
LE: loop exit
PB: predicated region body
PF: predicated region fallthrough
CT: control target
= control target key end

     0   :  { %s3239_s0 = inlined_call_operand.<no memory space> [shape: s32[1], index: 0, kind: input, shape index: {}]   ;;  %s3240_s1 = inlined_call_operand.hbm [shape: f32[512,128], index: 1, kind: input, shape index: {}]   ;;  %s3241_s2 = inlined_call_operand.vmem [shape: f32[1,128], index: 2, kind: input, shape index: {}]   ;;  %s3242_s3 = inlined_call_operand.hbm [shape: f32[512,128], index: 3, kind: output, shape index: {}]  }
   0x1   :  { %8 = sst [smem:[#allocation3]] %s3239_s0 }
   0x2   :  { %9 = vsyncpa [#allocation5], 0 }
   0x3   :  { %11 = vsyncpa [#allocation5 + $0x1], 0 }
   0x4   :  { %12 = vsyncpa [#allocation6], 0 }
   0x5   :  { %14 = vsyncpa [#allocation6 + $0x1], 0  ;;  %s1973_s14 = smov 0   ;;  %s1975_s15 = smov 0  }
   0x6   :  { %s1977_s16 = smov 0   ;;  %s1979_s17 = smov 0  }
   0x7 LB: > { %s1994_s0 = sadd.s32 4294967295, %s1944_s17   ;;  %s1652_s18 = sadd.s32 4294967294, %s1944_s17   ;;  %s1944_s17 = sphi %s1979_s17, %s3389_s17   ;;  %s1940_s16 = sphi %s1977_s16, %s3388_s16   ;;  %s1936_s15 = sphi %s1975_s15, %s3387_s15   ;;  %s1932_s14 = sphi %s1973_s14, %s3386_s14  }
   0x8   : > { %s1998_s19 = sadd.s32 1, %s1944_s17   ;;  %s27_s20 = sadd.s32 1, %s1940_s16 }
   0x9   : > { %s24_s21 = ssub.s32 %s1944_s17, %s1998_s19  ;;  %p34_p0 = scmp.ne.s32.totalorder %s1940_s16, %s1936_s15 }
   0xa   : > { %p25_p1 = scmp.eq.s32.totalorder %s24_s21, 0  ;;  %p35_p2 = scmp.eq.s32.totalorder %s1944_s17, 0 }
   0xb   : > { %p40_p3 = scmp.ne.s32.totalorder %s1936_s15, %s1932_s14  ;;  %p41_p4 = scmp.eq.s32.totalorder %s1994_s0, 0 }
   0xc   : > { %s2010_s22 = scalar_select %p25_p1, %s1940_s16, %s27_s20  }
   0xd   : > { %p2012_p5 = por %p35_p2, %p34_p0  ;;  %p2016_p6 = por %p41_p4, %p40_p3 }
   0xe   : > { %p85_p7 = scmp.eq.s32.totalorder %s1994_s0, 1  ;;  %p91_p8 = scmp.eq.s32.totalorder %s1652_s18, 1 }
   0xf   : > { %p1681_p10 = scmp.lt.s32.totalorder %s1944_s17, 2  ;;  %s114_s27 = sand.u32 1, %s1940_s16  }
  0x10   : > { %p2023_p11 = por %p85_p7, %p34_p0  ;;  %p2027_p12 = por %p91_p8, %p40_p3 }
  0x11   : > { %s1667_s28 = sshll.u32 %s1944_s17, 8  ;;  %s1655_s29 = sshll.u32 %s114_s27, 8 }
  0x12   : > { %s123_s5 = scalar_lea.hbm %s3240_s1, %s1667_s28  ;;  %s118_s7 = scalar_lea.vmem [#allocation4], %s1655_s29 }
  0x13   : > { %s124_s6 = sshll.u32 %s123_s5, 4  ;;  %s126_s8 = sshll.u32 %s118_s7, 4  ;;  %s125_s6 = int_to_ptr.hbm [resolvable:$true] %s124_s6  ;;  %s127_s8 = int_to_ptr.vmem [resolvable:$true] %s126_s8 }
  0x14   : > { %p2038_p13 = pnand %p1681_p10, %p2012_p5  ;;  %p1658_p0 = scmp.ge.s32.totalorder %s1944_s17, 1 }
  0x15   : > { %p134_p1 = scmp.lt.s32.totalorder %s1944_s17, 3  ;;  %s115_s10 = scalar_lea.sflag [#allocation5], %s114_s27 }
  0x16   : > { %s1848_s11 = sshra.s32 %s125_s6, 4  ;;  %p1852_p3 = pneg %p2038_p13  ;;  %s1849_s11 = int_to_ptr.hbm [resolvable:$true] %s1848_s11 }
  0x17   : > { %s1850_s12 = scalar_lea.hbm %s1849_s11, 256  ;;  %s1855_s20 = scalar_lea.hbm %s3240_s1, 512 }
  0x18   : > { %p1851_p2 = scmp.ne.s32.totalorder %s1849_s11, %s1850_s12  ;;  %p1856_p5 = scmp.lt.s32.totalorder %s1849_s11, %s3240_s1 }
  0x19   : > { %p1857_p8 = scmp.lt.s32.totalorder %s1855_s20, %s1850_s12 }
  0x1a   : > { %p1853_p4 = pnand %p1852_p3, %p1851_p2 }
  0x1b   : > { %p1858_p10 = por %p1857_p8, %p1856_p5 }
  0x1c   : > { %p1854_p7 = pneg %p1853_p4 }
  0x1e   : > { %p1859_p9 = pnand %p1858_p10, %p1854_p7 }
  0x20   : > { %1862 = shalt.err (!%p1859_p9)
}
  0x21   : > { %s1946_s27 = smov 128   ;;  %s1947_s28 = smov 8  }
  0x22   : > { %1676 = dma.hbm_to_vmem [thread:$0]  (!%p2038_p13), %s125_s6, 4096, %s127_s8, %s115_s10, %s1946_s27, %s1946_s27, %s1947_s28  }
  0x23   : > { %p135_p2 = pnand %p1658_p0, %p134_p1 }
  0x25   : > { %138 = sbr.rel (%p135_p2) target bundleno = 534 (0x216), region = 28 }
  0x2a   : > { %s2059_s29 = sand.u32 1, %s1936_s15  }
  0x2b   : > { %s1659_s30 = sshll.u32 %s2059_s29, 8  ;;  %s141_s4 = scalar_lea.sflag [#allocation5], %s2059_s29 }
  0x2c   : > { %s2065_s5 = scalar_lea.vmem [#allocation4], %s1659_s30 }
  0x2d   : > { %1923 = dma.done.wait (%p2016_p6), %s141_s4, 4096  }
  0x2e   : > { %1925 = vsyncadd (%p2016_p6), %s141_s4, 4294963200  ;;  %v172_v0 = vld [vmem:[%s2065_s5 + $0x20] sm:$0xff]  ;;  %v170_v2 = vld [vmem:[%s2065_s5 + $0x10] sm:$0xff]  ;;  %s2314_s24 = sld [smem:[#allocation3]]  ;;  %s1661_s12 = sshll.u32 %s1994_s0, 8 }
  0x2f   : > { %v2075_v1 = vld [vmem:[%s3241_s2] ss:$0 sm:$0xff]  ;;  %v173_v7 = vld [vmem:[%s2065_s5 + $0x28] sm:$0xff]  ;;  %v171_v8 = vld [vmem:[%s2065_s5 + $0x18] sm:$0xff]  ;;  %s2560_s23 = scalar_lea.vmem [#allocation7], %s1659_s30  ;;  %s1575_s30 = scalar_lea.hbm %s3242_s3, %s1661_s12 }
  0x30   : > { %v168_v3 = vld [vmem:[%s2065_s5] sm:$0xff]  ;;  %v2080_v4 = vadd.f32 %v2075_v1, %v172_v0  ;;  %v2083_v5 = vadd.f32 %v2075_v1, %v170_v2  ;;  %v169_v9 = vld [vmem:[%s2065_s5 + $0x8] sm:$0xff]  ;;  %v2095_v10 = vadd.f32 %v2075_v1, %v173_v7  ;;  %v2098_v11 = vadd.f32 %v2075_v1, %v171_v8  ;;  %v175_v14 = vld [vmem:[%s2065_s5 + $0x38] sm:$0xff]  ;;  %s1576_s4 = sshll.u32 %s2560_s23, 4  ;;  %s1564_s6 = scalar_lea.sflag [#allocation6], %s2059_s29  ;;  %s1577_s4 = int_to_ptr.vmem [resolvable:$true] %s1576_s4 }
  0x31   : > { %v2086_v6 = vadd.f32 %v2075_v1, %v168_v3  ;;  %v2101_v12 = vadd.f32 %v2075_v1, %v169_v9  ;;  %v176_v13 = vld [vmem:[%s2065_s5 + $0x40] sm:$0xff]  ;;  %v174_v15 = vld [vmem:[%s2065_s5 + $0x30] sm:$0xff]  ;;  %v2113_v17 = vadd.f32 %v2075_v1, %v175_v14  ;;  %v179_v19 = vld [vmem:[%s2065_s5 + $0x58] sm:$0xff] }
  0x32   : > { %244 = vmax.xlane.f32.xlu2 %v2080_v4  ;;  %240 = vmax.xlane.f32.xlu1 %v2083_v5  ;;  %v2110_v16 = vadd.f32 %v2075_v1, %v176_v13  ;;  %v2116_v18 = vadd.f32 %v2075_v1, %v174_v15  ;;  %v178_v20 = vld [vmem:[%s2065_s5 + $0x50] sm:$0xff]  ;;  %v177_v21 = vld [vmem:[%s2065_s5 + $0x48] sm:$0xff]  ;;  %v2125_v22 = vadd.f32 %v2075_v1, %v179_v19  ;;  %v180_v27 = vld [vmem:[%s2065_s5 + $0x60] sm:$0xff] }
  0x33   : > { %236 = vmax.xlane.f32.xlu0 %v2086_v6  ;;  %v2128_v23 = vadd.f32 %v2075_v1, %v178_v20  ;;  %v2131_v24 = vadd.f32 %v2075_v1, %v177_v21  ;;  %v182_v25 = vld [vmem:[%s2065_s5 + $0x70] sm:$0xff]  ;;  %v181_v26 = vld [vmem:[%s2065_s5 + $0x68] sm:$0xff]  ;;  %v2146_v30 = vadd.f32 %v2075_v1, %v180_v27  ;;  %v184_v32 = vld [vmem:[%s2065_s5 + $0x80] sm:$0xff] }
  0x34   : > { %v2140_v28 = vadd.f32 %v2075_v1, %v182_v25  ;;  %v2143_v29 = vadd.f32 %v2075_v1, %v181_v26  ;;  %v185_v31 = vld [vmem:[%s2065_s5 + $0x88] sm:$0xff]  ;;  %v183_v33 = vld [vmem:[%s2065_s5 + $0x78] sm:$0xff]  ;;  %v2158_v35 = vadd.f32 %v2075_v1, %v184_v32  ;;  %v188_v37 = vld [vmem:[%s2065_s5 + $0xa0] sm:$0xff]  ;;  %s1106_s8 = sshrl.u32 %s2314_s24, 16 }
  0x35   : > { %v2155_v34 = vadd.f32 %v2075_v1, %v185_v31  ;;  %v2161_v36 = vadd.f32 %v2075_v1, %v183_v33  ;;  %v187_v38 = vld [vmem:[%s2065_s5 + $0x98] sm:$0xff]  ;;  %v186_v39 = vld [vmem:[%s2065_s5 + $0x90] sm:$0xff]  ;;  %v2170_v40 = vadd.f32 %v2075_v1, %v188_v37  ;;  %v189_v45 = vld [vmem:[%s2065_s5 + $0xa8] sm:$0xff]  ;;  %s1107_s9 = sxor.u32 %s1106_s8, %s2314_s24 }
  0x36   : > { %v2173_v41 = vadd.f32 %v2075_v1, %v187_v38  ;;  %v2176_v42 = vadd.f32 %v2075_v1, %v186_v39  ;;  %v191_v43 = vld [vmem:[%s2065_s5 + $0xb8] sm:$0xff]  ;;  %v190_v44 = vld [vmem:[%s2065_s5 + $0xb0] sm:$0xff]  ;;  %v2191_v48 = vadd.f32 %v2075_v1, %v189_v45  ;;  %v193_v50 = vld [vmem:[%s2065_s5 + $0xc8] sm:$0xff]  ;;  %s1108_s10 = smul.u32 2146121005, %s1107_s9  ;;  %s1898_s9 = scalar_lea.hbm %s3242_s3, 512 }
  0x37   : > { %v2185_v46 = vadd.f32 %v2075_v1, %v191_v43  ;;  %v2188_v47 = vadd.f32 %v2075_v1, %v190_v44  ;;  %v194_v49 = vld [vmem:[%s2065_s5 + $0xd0] sm:$0xff]  ;;  %v192_v51 = vld [vmem:[%s2065_s5 + $0xc0] sm:$0xff]  ;;  %v2203_v53 = vadd.f32 %v2075_v1, %v193_v50  ;;  %v197_v55 = vld [vmem:[%s2065_s5 + $0xe8] sm:$0xff] }
  0x38   : > { %v2200_v52 = vadd.f32 %v2075_v1, %v194_v49  ;;  %v2206_v54 = vadd.f32 %v2075_v1, %v192_v51  ;;  %v196_v56 = vld [vmem:[%s2065_s5 + $0xe0] sm:$0xff]  ;;  %v195_v57 = vld [vmem:[%s2065_s5 + $0xd8] sm:$0xff]  ;;  %v2215_v58 = vadd.f32 %v2075_v1, %v197_v55  ;;  %v198_v62 = vld [vmem:[%s2065_s5 + $0xf0] sm:$0xff]  ;;  %s1109_s11 = sshrl.u32 %s1108_s10, 15 }
  0x39   : > { %v2218_v59 = vadd.f32 %v2075_v1, %v196_v56  ;;  %v2221_v60 = vadd.f32 %v2075_v1, %v195_v57  ;;  %v199_v61 = vld [vmem:[%s2065_s5 + $0xf8] sm:$0xff]  ;;  %v2232_v0 = vadd.f32 %v2075_v1, %v198_v62  ;;  %s1110_s13 = sxor.u32 %s1109_s11, %s1108_s10  ;;  %s1578_s5 = sshll.u32 %s1575_s30, 4  ;;  %s1579_s5 = int_to_ptr.hbm [resolvable:$true] %s1578_s5 }
  0x3a   : > { %246 = vmax.xlane.f32.xlu2 %v2095_v10  ;;  %242 = vmax.xlane.f32.xlu1 %v2098_v11  ;;  %v2229_v63 = vadd.f32 %v2075_v1, %v199_v61  ;;  %s1111_s18 = smul.u32 2221713035, %s1110_s13  ;;  %s1892_s7 = sshra.s32 %s1579_s5, 4  ;;  %s1893_s7 = int_to_ptr.hbm [resolvable:$true] %s1892_s7 }
  0x3b   : > { %238 = vmax.xlane.f32.xlu0 %v2101_v12  ;;  %s1894_s0 = scalar_lea.hbm %s1893_s7, 256  ;;  %p1899_p0 = scmp.lt.s32.totalorder %s1893_s7, %s3242_s3 }
  0x3c   : > { %s1112_s20 = sshrl.u32 %s1111_s18, 16  ;;  %p1895_p6 = scmp.ne.s32.totalorder %s1893_s7, %s1894_s0 }
  0x3d   : > { %s1113_s21 = sxor.u32 %s1112_s20, %s1111_s18  ;;  %p1900_p1 = scmp.lt.s32.totalorder %s1898_s9, %s1894_s0 }
  0x3e   : > { %p1896_p9 = pnand %p1895_p6, %p2023_p11 }
  0x3f   : > { %p1901_p3 = por %p1900_p1, %p1899_p0 }
  0x40   : > { %p1897_p13 = pneg %p1896_p9 }
  0x42   : > { %252 = vmax.xlane.f32.xlu2 %v2110_v16  ;;  %250 = vmax.xlane.f32.xlu1 %v2113_v17  ;;  %p1902_p4 = pnand %p1901_p3, %p1897_p13 }
  0x43   : > { %248 = vmax.xlane.f32.xlu0 %v2116_v18 }
  0x4a   : > { %258 = vmax.xlane.f32.xlu2 %v2125_v22  ;;  %256 = vmax.xlane.f32.xlu1 %v2128_v23 }
  0x4b   : > { %254 = vmax.xlane.f32.xlu0 %v2131_v24 }
  0x52   : > { %264 = vmax.xlane.f32.xlu2 %v2140_v28  ;;  %262 = vmax.xlane.f32.xlu1 %v2143_v29 }
  0x53   : > { %260 = vmax.xlane.f32.xlu0 %v2146_v30 }
  0x5a   : > { %270 = vmax.xlane.f32.xlu2 %v2155_v34  ;;  %268 = vmax.xlane.f32.xlu1 %v2158_v35 }
  0x5b   : > { %266 = vmax.xlane.f32.xlu0 %v2161_v36 }
  0x62   : > { %276 = vmax.xlane.f32.xlu2 %v2170_v40  ;;  %274 = vmax.xlane.f32.xlu1 %v2173_v41 }
  0x63   : > { %272 = vmax.xlane.f32.xlu0 %v2176_v42 }
  0x6a   : > { %282 = vmax.xlane.f32.xlu2 %v2185_v46  ;;  %280 = vmax.xlane.f32.xlu1 %v2188_v47 }
  0x6b   : > { %278 = vmax.xlane.f32.xlu0 %v2191_v48 }
  0x72   : > { %288 = vmax.xlane.f32.xlu2 %v2200_v52  ;;  %286 = vmax.xlane.f32.xlu1 %v2203_v53 }
  0x73   : > { %284 = vmax.xlane.f32.xlu0 %v2206_v54 }
  0x7a   : > { %294 = vmax.xlane.f32.xlu2 %v2215_v58  ;;  %292 = vmax.xlane.f32.xlu1 %v2218_v59 }
  0x7b   : > { %290 = vmax.xlane.f32.xlu0 %v2221_v60 }
  0x82   : > { %298 = vmax.xlane.f32.xlu1 %v2229_v63 }
  0x83   : > { %296 = vmax.xlane.f32.xlu0 %v2232_v0 }
  0xa5   : > { %v245_v2 = vpop.xlane.xlu2 %244  ;;  %v241_v3 = vpop.xlane.xlu1 %240 }
  0xa6   : > { %v302_v7 = vsub.f32 %v2083_v5, %v241_v3  ;;  %v237_v8 = vpop.xlane.xlu0 %236  ;;  %v304_v5 = vsub.f32 %v2080_v4, %v245_v2 }
  0xa7   : > { %v300_v9 = vsub.f32 %v2086_v6, %v237_v8 }
  0xa8   : > { %v336_v13 = vmul.f32 1.442695, %v302_v7 }
  0xa9   : > { %v332_v14 = vmul.f32 1.442695, %v300_v9 }
  0xaa   : > { %1720 = vpow2.f32 %v336_v13 }
  0xab   : > { %1722 = vpow2.f32 %v332_v14 }
  0xad   : > { %v247_v15 = vpop.xlane.xlu2 %246  ;;  %v243_v19 = vpop.xlane.xlu1 %242 }
  0xae   : > { %v305_v1 = vsub.f32 %v2095_v10, %v247_v15  ;;  %v303_v20 = vsub.f32 %v2098_v11, %v243_v19  ;;  %v239_v21 = vpop.xlane.xlu0 %238  ;;  %v340_v10 = vmul.f32 1.442695, %v304_v5 }
  0xaf   : > { %v301_v25 = vsub.f32 %v2101_v12, %v239_v21 }
  0xb0   : > { %v342_v26 = vmul.f32 1.442695, %v305_v1  ;;  %v338_v27 = vmul.f32 1.442695, %v303_v20  ;;  %v2241_v31 = vpop.eup %1720 }
  0xb1   : > { %v334_v6 = vmul.f32 1.442695, %v301_v25  ;;  %v2244_v32 = vpop.eup %1722  ;;  %400 = vadd.xlane.f32.xlu1 %v2241_v31 }
  0xb2   : > { %1724 = vpow2.f32 %v342_v26  ;;  %396 = vadd.xlane.f32.xlu2 %v2244_v32 }
  0xb3   : > { %1726 = vpow2.f32 %v338_v27 }
  0xb4   : > { %1728 = vpow2.f32 %v334_v6 }
  0xb5   : > { %v253_v11 = vpop.xlane.xlu2 %252  ;;  %v251_v33 = vpop.xlane.xlu1 %250  ;;  %1730 = vpow2.f32 %v340_v10 }
  0xb6   : > { %v308_v12 = vsub.f32 %v2110_v16, %v253_v11  ;;  %v249_v37 = vpop.xlane.xlu0 %248  ;;  %v307_v45 = vsub.f32 %v2113_v17, %v251_v33 }
  0xb7   : > { %v306_v38 = vsub.f32 %v2116_v18, %v249_v37 }
  0xb8   : > { %v2250_v39 = vpop.eup %1724  ;;  %v348_v4 = vmul.f32 1.442695, %v308_v12  ;;  %v346_v18 = vmul.f32 1.442695, %v307_v45 }
  0xb9   : > { %v2252_v43 = vpop.eup %1726  ;;  %v344_v44 = vmul.f32 1.442695, %v306_v38  ;;  %406 = vadd.xlane.f32.xlu1 %v2250_v39 }
  0xba   : > { %v2255_v49 = vpop.eup %1728  ;;  %1732 = vpow2.f32 %v348_v4  ;;  %402 = vadd.xlane.f32.xlu2 %v2252_v43 }
  0xbb   : > { %1734 = vpow2.f32 %v344_v44  ;;  %398 = vadd.xlane.f32.xlu0 %v2255_v49  ;;  %v2261_v56 = vpop.eup %1730 }
  0xbc   : > { %1736 = vpow2.f32 %v346_v18 }
  0xbd   : > { %v259_v16 = vpop.xlane.xlu2 %258  ;;  %v257_v50 = vpop.xlane.xlu1 %256 }
  0xbe   : > { %v311_v51 = vsub.f32 %v2125_v22, %v259_v16  ;;  %v255_v55 = vpop.xlane.xlu0 %254  ;;  %v310_v3 = vsub.f32 %v2128_v23, %v257_v50 }
  0xbf   : > { %v309_v17 = vsub.f32 %v2131_v24, %v255_v55 }
  0xc0   : > { %v2264_v57 = vpop.eup %1732  ;;  %v354_v61 = vmul.f32 1.442695, %v311_v51  ;;  %v352_v7 = vmul.f32 1.442695, %v310_v3 }
  0xc1   : > { %v2266_v62 = vpop.eup %1734  ;;  %v350_v2 = vmul.f32 1.442695, %v309_v17  ;;  %412 = vadd.xlane.f32.xlu1 %v2264_v57 }
  0xc2   : > { %1738 = vpow2.f32 %v354_v61  ;;  %408 = vadd.xlane.f32.xlu2 %v2266_v62  ;;  %v2273_v13 = vpop.eup %1736 }
  0xc3   : > { %1740 = vpow2.f32 %v350_v2  ;;  %404 = vadd.xlane.f32.xlu0 %v2261_v56 }
  0xc4   : > { %1742 = vpow2.f32 %v352_v7 }
  0xc5   : > { %v265_v22 = vpop.xlane.xlu2 %264  ;;  %v263_v24 = vpop.xlane.xlu1 %262 }
  0xc6   : > { %v314_v8 = vsub.f32 %v2140_v28, %v265_v22  ;;  %v261_v9 = vpop.xlane.xlu0 %260  ;;  %v313_v20 = vsub.f32 %v2143_v29, %v263_v24 }
  0xc7   : > { %v312_v14 = vsub.f32 %v2146_v30, %v261_v9 }
  0xc8   : > { %v2276_v15 = vpop.eup %1738  ;;  %v360_v23 = vmul.f32 1.442695, %v314_v8  ;;  %v358_v21 = vmul.f32 1.442695, %v313_v20 }
  0xc9   : > { %v2278_v19 = vpop.eup %1740  ;;  %v356_v1 = vmul.f32 1.442695, %v312_v14  ;;  %418 = vadd.xlane.f32.xlu1 %v2276_v15 }
  0xca   : > { %1744 = vpow2.f32 %v360_v23  ;;  %414 = vadd.xlane.f32.xlu2 %v2278_v19  ;;  %v2285_v27 = vpop.eup %1742 }
  0xcb   : > { %1746 = vpow2.f32 %v356_v1  ;;  %410 = vadd.xlane.f32.xlu0 %v2273_v13 }
  0xcc   : > { %1748 = vpow2.f32 %v358_v21 }
  0xcd   : > { %v271_v28 = vpop.xlane.xlu2 %270  ;;  %v269_v30 = vpop.xlane.xlu1 %268 }
  0xce   : > { %v317_v25 = vsub.f32 %v2155_v34, %v271_v28  ;;  %v267_v26 = vpop.xlane.xlu0 %266  ;;  %v316_v33 = vsub.f32 %v2158_v35, %v269_v30 }
  0xcf   : > { %v315_v5 = vsub.f32 %v2161_v36, %v267_v26  ;;  %v973_v26 = vlaneseq }
  0xd0   : > { %v2288_v6 = vpop.eup %1744  ;;  %v366_v29 = vmul.f32 1.442695, %v317_v25  ;;  %v364_v12 = vmul.f32 1.442695, %v316_v33 }
  0xd1   : > { %v2290_v10 = vpop.eup %1746  ;;  %v362_v11 = vmul.f32 1.442695, %v315_v5  ;;  %424 = vadd.xlane.f32.xlu1 %v2288_v6 }
  0xd2   : > { %1750 = vpow2.f32 %v366_v29  ;;  %420 = vadd.xlane.f32.xlu2 %v2290_v10  ;;  %v2297_v4 = vpop.eup %1748 }
  0xd3   : > { %1752 = vpow2.f32 %v362_v11  ;;  %416 = vadd.xlane.f32.xlu0 %v2285_v27 }
  0xd4   : > { %1754 = vpow2.f32 %v364_v12 }
  0xd5   : > { %v277_v34 = vpop.xlane.xlu2 %276  ;;  %v275_v36 = vpop.xlane.xlu1 %274 }
  0xd6   : > { %v320_v37 = vsub.f32 %v2170_v40, %v277_v34  ;;  %v273_v38 = vpop.xlane.xlu0 %272  ;;  %v319_v50 = vsub.f32 %v2173_v41, %v275_v36 }
  0xd7   : > { %v318_v44 = vsub.f32 %v2176_v42, %v273_v38 }
  0xd8   : > { %v2300_v45 = vpop.eup %1750  ;;  %v372_v35 = vmul.f32 1.442695, %v320_v37  ;;  %v370_v51 = vmul.f32 1.442695, %v319_v50  ;;  %v2344_v37 = vshrl.u32 %v973_v26, 7 }
  0xd9   : > { %v2302_v16 = vpop.eup %1752  ;;  %v368_v18 = vmul.f32 1.442695, %v318_v44  ;;  %430 = vadd.xlane.f32.xlu1 %v2300_v45 }
  0xda   : > { %1756 = vpow2.f32 %v372_v35  ;;  %426 = vadd.xlane.f32.xlu2 %v2302_v16  ;;  %v2309_v61 = vpop.eup %1754  ;;  %v2354_v35 = vstv %s1661_s12 }
  0xdb   : > { %1758 = vpow2.f32 %v368_v18  ;;  %422 = vadd.xlane.f32.xlu0 %v2297_v4 }
  0xdc   : > { %1760 = vpow2.f32 %v370_v51 }
  0xdd   : > { %v283_v40 = vpop.xlane.xlu2 %282  ;;  %v281_v42 = vpop.xlane.xlu1 %280 }
  0xde   : > { %v323_v55 = vsub.f32 %v2185_v46, %v283_v40  ;;  %v279_v17 = vpop.xlane.xlu0 %278  ;;  %v322_v24 = vsub.f32 %v2188_v47, %v281_v42 }
  0xdf   : > { %v321_v2 = vsub.f32 %v2191_v48, %v279_v17 }
  0xe0   : > { %v2312_v3 = vpop.eup %1756  ;;  %v378_v41 = vmul.f32 1.442695, %v323_v55  ;;  %v376_v48 = vmul.f32 1.442695, %v322_v24 }
  0xe1   : > { %v2316_v22 = vpop.eup %1758  ;;  %v374_v7 = vmul.f32 1.442695, %v321_v2  ;;  %436 = vadd.xlane.f32.xlu1 %v2312_v3 }
  0xe2   : > { %1762 = vpow2.f32 %v378_v41  ;;  %432 = vadd.xlane.f32.xlu2 %v2316_v22  ;;  %v2323_v23 = vpop.eup %1760 }
  0xe3   : > { %1764 = vpow2.f32 %v374_v7  ;;  %428 = vadd.xlane.f32.xlu0 %v2309_v61  ;;  %3260 = vst [vmem:[#allocation10_spill] sm:$0xff] %v2323_v23 }
  0xe4   : > { %1766 = vpow2.f32 %v376_v48  ;;  %v2377_v48 = vstv %s1113_s21 }
  0xe5   : > { %v289_v46 = vpop.xlane.xlu2 %288  ;;  %v287_v8 = vpop.xlane.xlu1 %286 }
  0xe6   : > { %v326_v9 = vsub.f32 %v2200_v52, %v289_v46  ;;  %v285_v14 = vpop.xlane.xlu0 %284  ;;  %v325_v30 = vsub.f32 %v2203_v53, %v287_v8 }
  0xe7   : > { %v324_v1 = vsub.f32 %v2206_v54, %v285_v14 }
  0xe8   : > { %v2326_v47 = vpop.eup %1762  ;;  %v384_v20 = vmul.f32 1.442695, %v326_v9  ;;  %v382_v54 = vmul.f32 1.442695, %v325_v30 }
  0xe9   : > { %3261 = vst [vmem:[#allocation11_spill] sm:$0xff] %v2326_v47  ;;  %v2329_v28 = vpop.eup %1764  ;;  %v380_v21 = vmul.f32 1.442695, %v324_v1  ;;  %442 = vadd.xlane.f32.xlu1 %v2326_v47 }
  0xea   : > { %3262 = vst [vmem:[#allocation12_spill] sm:$0xff] %v2329_v28  ;;  %1768 = vpow2.f32 %v384_v20  ;;  %438 = vadd.xlane.f32.xlu2 %v2329_v28  ;;  %v2337_v11 = vpop.eup %1766  ;;  %v979_v20 = vadd.s32 40, %v2344_v37 }
  0xeb   : > { %1770 = vpow2.f32 %v380_v21  ;;  %434 = vadd.xlane.f32.xlu0 %v2323_v23  ;;  %3263 = vst [vmem:[#allocation13_spill] sm:$0xff] %v2337_v11  ;;  %v977_v21 = vadd.s32 24, %v2344_v37 }
  0xec   : > { %1772 = vpow2.f32 %v382_v54 }
  0xed   : > { %v295_v52 = vpop.xlane.xlu2 %294  ;;  %v293_v25 = vpop.xlane.xlu1 %292 }
  0xee   : > { %v329_v5 = vsub.f32 %v2215_v58, %v295_v52  ;;  %v291_v29 = vpop.xlane.xlu0 %290  ;;  %v328_v58 = vsub.f32 %v2218_v59, %v293_v25  ;;  %v975_v52 = vadd.s32 8, %v2344_v37  ;;  %v1012_v25 = vadd.s32 %v2354_v35, %v979_v20 }
  0xef   : > { %v327_v53 = vsub.f32 %v2221_v60, %v291_v29  ;;  %v976_v60 = vadd.s32 16, %v2344_v37 }
  0xf0   : > { %v2340_v33 = vpop.eup %1768  ;;  %v390_v34 = vmul.f32 1.442695, %v329_v5  ;;  %v388_v38 = vmul.f32 1.442695, %v328_v58  ;;  %v1008_v29 = vadd.s32 %v2354_v35, %v975_v52 }
  0xf1   : > { %3264 = vst [vmem:[#allocation14_spill] sm:$0xff] %v2340_v33  ;;  %v2342_v12 = vpop.eup %1770  ;;  %v386_v36 = vmul.f32 1.442695, %v327_v53  ;;  %448 = vadd.xlane.f32.xlu1 %v2340_v33  ;;  %v1009_v55 = vadd.s32 %v2354_v35, %v976_v60  ;;  %v1046_v53 = vmul.u32 128, %v1012_v25 }
  0xf2   : > { %3265 = vst [vmem:[#allocation15_spill] sm:$0xff] %v2342_v12  ;;  %1774 = vpow2.f32 %v390_v34  ;;  %444 = vadd.xlane.f32.xlu2 %v2342_v12  ;;  %v2356_v18 = vpop.eup %1772 }
  0xf3   : > { %1776 = vpow2.f32 %v386_v36  ;;  %440 = vadd.xlane.f32.xlu0 %v2337_v11  ;;  %3266 = vst [vmem:[#allocation16_spill] sm:$0xff] %v2356_v18  ;;  %v1043_v2 = vmul.u32 128, %v1009_v55  ;;  %v1042_v36 = vmul.u32 128, %v1008_v29 }
  0xf4   : > { %1778 = vpow2.f32 %v388_v38 }
  0xf5   : > { %v299_v59 = vpop.xlane.xlu1 %298 }
  0xf6   : > { %v297_v44 = vpop.xlane.xlu0 %296  ;;  %v331_v17 = vsub.f32 %v2229_v63, %v299_v59  ;;  %v1007_v63 = vadd.s32 %v2354_v35, %v2344_v37 }
  0xf7   : > { %v330_v50 = vsub.f32 %v2232_v0, %v297_v44  ;;  %v2368_v0 = vand.u32 127, %v973_v26  ;;  %v1010_v26 = vadd.s32 %v2354_v35, %v977_v21 }
  0xf8   : > { %v2359_v40 = vpop.eup %1774  ;;  %v394_v41 = vmul.f32 1.442695, %v331_v17  ;;  %v1041_v8 = vmul.u32 128, %v1007_v63 }
  0xf9   : > { %3267 = vst [vmem:[#allocation17_spill] sm:$0xff] %v2359_v40  ;;  %v2361_v51 = vpop.eup %1776  ;;  %v392_v42 = vmul.f32 1.442695, %v330_v50  ;;  %454 = vadd.xlane.f32.xlu1 %v2359_v40  ;;  %v1075_v46 = vadd.s32 %v1043_v2, %v2368_v0  ;;  %v1044_v34 = vmul.u32 128, %v1010_v26  ;;  %v1078_v60 = vadd.s32 %v1046_v53, %v2368_v0 }
  0xfa   : > { %3268 = vst [vmem:[#allocation18_spill] sm:$0xff] %v2361_v51  ;;  %450 = vadd.xlane.f32.xlu2 %v2361_v51  ;;  %v2370_v7 = vpop.eup %1778  ;;  %v1073_v14 = vadd.s32 %v1041_v8, %v2368_v0  ;;  %v1074_v50 = vadd.s32 %v1042_v36, %v2368_v0  ;;  %v980_v26 = vadd.s32 48, %v2344_v37 }
  0xfb   : > { %1780 = vpow2.f32 %v392_v42  ;;  %446 = vadd.xlane.f32.xlu0 %v2356_v18  ;;  %3269 = vst [vmem:[#allocation19_spill] sm:$0xff] %v2370_v7  ;;  %v1117_v9 = vxor.u32 %v2377_v48, %v1075_v46  ;;  %v1076_v38 = vadd.s32 %v1044_v34, %v2368_v0  ;;  %v1120_v59 = vxor.u32 %v2377_v48, %v1078_v60 }
  0xfc   : > { %1782 = vpow2.f32 %v394_v41  ;;  %v1115_v1 = vxor.u32 %v2377_v48, %v1073_v14  ;;  %v1116_v55 = vxor.u32 %v2377_v48, %v1074_v50 }
  0xfd   : > { %v1149_v54 = vshrl.u32 %v1117_v9, 16  ;;  %v1118_v42 = vxor.u32 %v2377_v48, %v1076_v38  ;;  %v1152_v2 = vshrl.u32 %v1120_v59, 16 }
  0xfe   : > { %v1147_v5 = vshrl.u32 %v1115_v1, 16  ;;  %v1148_v63 = vshrl.u32 %v1116_v55, 16 }
  0xff   : > { %v1181_v58 = vxor.u32 %v1149_v54, %v1117_v9  ;;  %v1150_v41 = vshrl.u32 %v1118_v42, 16  ;;  %v1184_v8 = vxor.u32 %v1152_v2, %v1120_v59 }
 0x100   : > { %v1179_v44 = vxor.u32 %v1147_v5, %v1115_v1  ;;  %v1180_v14 = vxor.u32 %v1148_v63, %v1116_v55  ;;  %v982_v1 = vadd.s32 64, %v2344_v37  ;;  %v978_v5 = vadd.s32 32, %v2344_v37 }
 0x101   : > { %v2372_v24 = vpop.eup %1780  ;;  %v1213_v17 = vmul.u32 2146121005, %v1181_v58  ;;  %v1182_v9 = vxor.u32 %v1150_v41, %v1118_v42  ;;  %v1216_v21 = vmul.u32 2146121005, %v1184_v8  ;;  %v1013_v58 = vadd.s32 %v2354_v35, %v980_v26 }
 0x102   : > { %3270 = vst [vmem:[#allocation20_spill] sm:$0xff] %v2372_v24  ;;  %456 = vadd.xlane.f32.xlu2 %v2372_v24  ;;  %v2386_v30 = vpop.eup %1782  ;;  %v1211_v46 = vmul.u32 2146121005, %v1179_v44  ;;  %v1212_v25 = vmul.u32 2146121005, %v1180_v14  ;;  %v1015_v34 = vadd.s32 %v2354_v35, %v982_v1  ;;  %v1011_v60 = vadd.s32 %v2354_v35, %v978_v5 }
 0x103   : > { %452 = vadd.xlane.f32.xlu0 %v2370_v7  ;;  %3271 = vst [vmem:[#allocation21_spill] sm:$0xff] %v2386_v30  ;;  %v1245_v20 = vshrl.u32 %v1213_v17, 15  ;;  %v1214_v52 = vmul.u32 2146121005, %v1182_v9  ;;  %v1248_v29 = vshrl.u32 %v1216_v21, 15  ;;  %v1047_v59 = vmul.u32 128, %v1013_v58 }
 0x104   : > { %v1243_v54 = vshrl.u32 %v1211_v46, 15  ;;  %v1244_v36 = vshrl.u32 %v1212_v25, 15  ;;  %v1049_v44 = vmul.u32 128, %v1015_v34  ;;  %v1045_v42 = vmul.u32 128, %v1011_v60 }
 0x105   : > { %v1246_v53 = vshrl.u32 %v1214_v52, 15  ;;  %v1277_v38 = vxor.u32 %v1245_v20, %v1213_v17  ;;  %v1280_v55 = vxor.u32 %v1248_v29, %v1216_v21  ;;  %v1079_v8 = vadd.s32 %v1047_v59, %v2368_v0 }
 0x106   : > { %v1275_v50 = vxor.u32 %v1243_v54, %v1211_v46  ;;  %v1081_v41 = vadd.s32 %v1049_v44, %v2368_v0  ;;  %v1276_v63 = vxor.u32 %v1244_v36, %v1212_v25  ;;  %v1077_v9 = vadd.s32 %v1045_v42, %v2368_v0 }
 0x107   : > { %v1278_v2 = vxor.u32 %v1246_v53, %v1214_v52  ;;  %v1309_v14 = vmul.u32 2221713035, %v1277_v38  ;;  %v1121_v5 = vxor.u32 %v2377_v48, %v1079_v8  ;;  %v1312_v46 = vmul.u32 2221713035, %v1280_v55 }
 0x108   : > { %v1123_v1 = vxor.u32 %v2377_v48, %v1081_v41  ;;  %v1307_v26 = vmul.u32 2221713035, %v1275_v50  ;;  %v1119_v17 = vxor.u32 %v2377_v48, %v1077_v9  ;;  %v1308_v21 = vmul.u32 2221713035, %v1276_v63 }
 0x109   : > { %v1310_v20 = vmul.u32 2221713035, %v1278_v2  ;;  %v1153_v52 = vshrl.u32 %v1121_v5, 16  ;;  %v1341_v53 = vshrl.u32 %v1309_v14, 16  ;;  %v1344_v60 = vshrl.u32 %v1312_v46, 16 }
 0x10a   : > { %v1155_v54 = vshrl.u32 %v1123_v1, 16  ;;  %v1151_v29 = vshrl.u32 %v1119_v17, 16  ;;  %v1339_v34 = vshrl.u32 %v1307_v26, 16  ;;  %v1340_v59 = vshrl.u32 %v1308_v21, 16 }
 0x10b   : > { %458 = vadd.xlane.f32.xlu0 %v2386_v30  ;;  %v1185_v36 = vxor.u32 %v1153_v52, %v1121_v5  ;;  %v1342_v38 = vshrl.u32 %v1310_v20, 16  ;;  %v1373_v42 = vxor.u32 %v1341_v53, %v1309_v14  ;;  %v2417_v9 = vxor.u32 %v1344_v60, %v1312_v46 }
 0x10c   : > { %v1187_v25 = vxor.u32 %v1155_v54, %v1123_v1  ;;  %v1183_v58 = vxor.u32 %v1151_v29, %v1119_v17  ;;  %v1371_v2 = vxor.u32 %v1339_v34, %v1307_v26  ;;  %v2422_v17 = vxor.u32 %v1340_v59, %v1308_v21 }
 0x10d   : > { %v1217_v50 = vmul.u32 2146121005, %v1185_v36  ;;  %v2419_v1 = vxor.u32 %v1342_v38, %v1310_v20  ;;  %v1405_v52 = vshrl.u32 %v1373_v42, 8  ;;  %v985_v20 = vadd.s32 88, %v2344_v37 }
 0x10e   : > { %v1219_v44 = vmul.u32 2146121005, %v1187_v25  ;;  %v1215_v55 = vmul.u32 2146121005, %v1183_v58  ;;  %v1403_v25 = vshrl.u32 %v1371_v2, 8  ;;  %v983_v60 = vadd.s32 72, %v2344_v37 }
 0x10f   : > { %v1249_v54 = vshrl.u32 %v1217_v50, 15  ;;  %v981_v36 = vadd.s32 56, %v2344_v37  ;;  %vm2469_vm4 = vcmp.ge.s32.totalorder %v1405_v52, 1677722  ;;  %v3286_v2 = vshrl.u32 %v2417_v9, 8 }
 0x110   : > { %v1251_v8 = vshrl.u32 %v1219_v44, 15  ;;  %v1247_v53 = vshrl.u32 %v1215_v55, 15  ;;  %v2467_v7 = vadd.s32 %v2354_v35, %v983_v60  ;;  %vm2476_vm6 = vcmp.ge.s32.totalorder %v1403_v25, 1677722 }
 0x111   : > { %v2433_v58 = vxor.u32 %v1249_v54, %v1217_v50  ;;  %v2482_v52 = vadd.s32 %v2354_v35, %v981_v36 }
 0x112   : > { %v2424_v14 = vxor.u32 %v1251_v8, %v1219_v44  ;;  %v2446_v54 = vxor.u32 %v1247_v53, %v1215_v55  ;;  %v2462_v55 = vadd.s32 %v2354_v35, %v985_v20 }
 0x114   : > { %v1052_v25 = vmul.u32 128, %v2462_v55 }
 0x124   : > { %v2411_v41 = vpop.xlane.xlu1 %400 }
 0x125   : > { %1784 = vrcp.f32 %v2411_v41  ;;  %v2414_v63 = vpop.xlane.xlu2 %396  ;;  %v501_v5 = vand.u32 2147483648, %v2411_v41  ;;  %v499_v29 = vand.u32 2147483647, %v2411_v41  ;;  %vm495_vm0 = vweird.f32 %v2411_v41 }
 0x126   : > { %1786 = vrcp.f32 %v2414_v63  ;;  %v471_v26 = vand.u32 2147483648, %v2414_v63  ;;  %v469_v34 = vand.u32 2147483647, %v2414_v63  ;;  %vm465_vm1 = vweird.f32 %v2414_v63 }
 0x127   : > { %v502_v44 = vor.u32 1.1754944e-38, %v501_v5  ;;  %vm2440_vm2 = vcmp.eq.f32.partialorder %v499_v29, 8.507059e+37 }
 0x128   : > { %v472_v21 = vor.u32 1.1754944e-38, %v471_v26  ;;  %vm2450_vm3 = vcmp.eq.f32.partialorder %v469_v34, 8.507059e+37  ;;  %v3276_v26 = vmul.u32 2221713035, %v2424_v14 }
 0x12a   : > { %v1347_v30 = vshrl.u32 %v3276_v26, 16 }
 0x12b   : > { %v1785_v38 = vpop.eup %1784 }
 0x12c   : > { %v1787_v42 = vpop.eup %1786  ;;  %v491_v8 = vmul.f32 %v1785_v38, %v2411_v41  ;;  %v2444_v50 = vpop.xlane.xlu1 %406  ;;  %vm496_vm5 = vweird.f32 %v1785_v38 }
 0x12d   : > { %v461_v5 = vmul.f32 %v1787_v42, %v2414_v63  ;;  %1788 = vrcp.f32 %v2444_v50  ;;  %v2455_v59 = vpop.xlane.xlu2 %402  ;;  %v544_v51 = vand.u32 2147483647, %v2444_v50  ;;  %v546_v26 = vand.u32 2147483648, %v2444_v50  ;;  %vm497_vm10 = vmor %vm495_vm0, %vm496_vm5 }
 0x12e   : > { %v2457_v29 = vpop.xlane.xlu0 %398  ;;  %v492_v53 = vsub.f32 1.0, %v491_v8  ;;  %1790 = vrcp.f32 %v2455_v59  ;;  %v516_v20 = vand.u32 2147483648, %v2455_v59  ;;  %vm466_vm7 = vweird.f32 %v1787_v42 }
 0x12f   : > { %v462_v18 = vsub.f32 1.0, %v461_v5  ;;  %1792 = vrcp.f32 %v2457_v29  ;;  %v514_v5 = vand.u32 2147483647, %v2455_v59  ;;  %vm540_vm8 = vweird.f32 %v2444_v50  ;;  %vm467_vm12 = vmor %vm465_vm1, %vm466_vm7 }
 0x130   : > { %v493_v40 = vmul.f32 %v1785_v38, %v492_v53  ;;  %vm510_vm9 = vweird.f32 %v2455_v59  ;;  %vm2491_vm11 = vcmp.eq.f32.partialorder %v544_v51, 8.507059e+37  ;;  %v517_v33 = vor.u32 1.1754944e-38, %v516_v20 }
 0x131   : > { %v463_v60 = vmul.f32 %v1787_v42, %v462_v18  ;;  %v547_v18 = vor.u32 1.1754944e-38, %v546_v26  ;;  %v484_v55 = vand.u32 2147483647, %v2457_v29  ;;  %v486_v41 = vand.u32 2147483648, %v2457_v29 }
 0x132   : > { %v494_v11 = vadd.f32 %v1785_v38, %v493_v40  ;;  %vm2504_vm13 = vcmp.eq.f32.partialorder %v514_v5, 8.507059e+37  ;;  %vm480_vm14 = vweird.f32 %v2457_v29  ;;  %vm2521_vm0 = vcmp.ge.s32.totalorder %v3286_v2, 1677722 }
 0x133   : > { %v1789_v53 = vpop.eup %1788  ;;  %v464_v12 = vadd.f32 %v1787_v42, %v463_v60  ;;  %v3289_v5 = vmul.u32 2221713035, %v2433_v58  ;;  %v3296_v2 = vshrl.u32 %v2422_v17, 8  ;;  %vm2553_vm7 = vcmp.eq.f32.partialorder %v484_v55, 8.507059e+37 }
 0x134   : > { %v1791_v23 = vpop.eup %1790  ;;  %v498_v34 = vsel %vm497_vm10, %v1785_v38, %v494_v11  ;;  %v536_v40 = vmul.f32 %v1789_v53, %v2444_v50  ;;  %v3285_v11 = vmul.u32 2221713035, %v2424_v14  ;;  %v2513_v38 = vpop.xlane.xlu1 %412  ;;  %vm541_vm15 = vweird.f32 %v1789_v53 }
 0x135   : > { %v503_v51 = vsel %vm2440_vm2, %v502_v44, %v498_v34  ;;  %v468_v60 = vsel %vm467_vm12, %v1787_v42, %v464_v12  ;;  %v506_v28 = vmul.f32 %v1791_v23, %v2455_v59  ;;  %v1793_v20 = vpop.eup %1792  ;;  %1794 = vrcp.f32 %v2513_v38  ;;  %vm2539_vm2 = vmor %vm540_vm8, %vm541_vm15 }
 0x136   : > { %v2511_v63 = vxor.u32 %v1347_v30, %v3285_v11  ;;  %v942_v47 = vmul.f32 %v2241_v31, %v503_v51  ;;  %v473_v12 = vsel %vm2450_vm3, %v472_v21, %v468_v60  ;;  %v537_v44 = vsub.f32 1.0, %v536_v40 }
 0x137   : > { %v940_v42 = vmul.f32 %v2244_v32, %v473_v12  ;;  %v507_v30 = vsub.f32 1.0, %v506_v28  ;;  %v476_v14 = vmul.f32 %v1793_v20, %v2457_v29  ;;  %v1345_v11 = vshrl.u32 %v3289_v5, 16 }
 0x138   : > { %v1469_v31 = vmul.f32 1.1111112, %v942_v47  ;;  %v538_v46 = vmul.f32 %v1789_v53, %v537_v44  ;;  %v3290_v21 = vshrl.u32 %v2419_v1, 8  ;;  %v3293_v32 = vmul.u32 2221713035, %v2446_v54  ;;  %v2543_v1 = vpop.xlane.xlu2 %408 }
 0x139   : > { %v1467_v28 = vmul.f32 1.1111112, %v940_v42  ;;  %v508_v47 = vmul.f32 %v1791_v23, %v507_v30  ;;  %vm511_vm3 = vweird.f32 %v1791_v23  ;;  %v477_v60 = vsub.f32 1.0, %v476_v14 }
 0x13a   : > { %vm2530_vm1 = vcmp.ge.s32.totalorder %v3290_v21, 1677722  ;;  %v1343_v9 = vshrl.u32 %v3293_v32, 16  ;;  %v1501_v12 = vsel %vm2469_vm4, %v1469_v31, 0.0  ;;  %v539_v44 = vadd.f32 %v1789_v53, %v538_v46  ;;  %vm512_vm8 = vmor %vm510_vm9, %vm511_vm3 }
 0x13b   : > { %vm2549_vm5 = vcmp.ge.s32.totalorder %v3296_v2, 1677722  ;;  %v1084_v42 = vadd.s32 %v1052_v25, %v2368_v0  ;;  %1533 = vst [vmem:[%s2560_s23 + $0x10] sm:$0xff] %v1501_v12  ;;  %v1499_v24 = vsel %vm2476_vm6, %v1467_v28, 0.0  ;;  %v509_v17 = vadd.f32 %v1791_v23, %v508_v47  ;;  %v1795_v28 = vpop.eup %1794 }
 0x13c   : > { %v478_v30 = vmul.f32 %v1793_v20, %v477_v60  ;;  %vm481_vm4 = vweird.f32 %v1793_v20  ;;  %1531 = vst [vmem:[%s2560_s23] sm:$0xff] %v1499_v24  ;;  %v543_v55 = vsel %vm2539_vm2, %v1789_v53, %v539_v44  ;;  %v487_v25 = vor.u32 1.1754944e-38, %v486_v41 }
 0x13d   : > { %v3301_v14 = vmul.u32 2221713035, %v2433_v58  ;;  %1796 = vrcp.f32 %v2543_v1  ;;  %v548_v8 = vsel %vm2491_vm11, %v547_v18, %v543_v55  ;;  %v513_v46 = vsel %vm512_vm8, %v1791_v23, %v509_v17  ;;  %vm482_vm6 = vmor %vm480_vm14, %vm481_vm4  ;;  %v2607_v17 = vpop.xlane.xlu1 %418 }
 0x13e   : > { %v479_v21 = vadd.f32 %v1793_v20, %v478_v30  ;;  %v1411_v32 = vshrl.u32 %v2511_v63, 8  ;;  %v945_v53 = vmul.f32 %v2250_v39, %v548_v8  ;;  %v518_v59 = vsel %vm2504_vm13, %v517_v33, %v513_v46  ;;  %v2587_v63 = vpop.xlane.xlu0 %404 }
 0x13f   : > { %v1377_v31 = vxor.u32 %v1345_v11, %v3301_v14  ;;  %vm585_vm9 = vweird.f32 %v2513_v38  ;;  %v589_v58 = vand.u32 2147483647, %v2513_v38  ;;  %v943_v36 = vmul.f32 %v2252_v43, %v518_v59 }
 0x140   : > { %v483_v18 = vsel %vm482_vm6, %v1793_v20, %v479_v21  ;;  %v581_v23 = vmul.f32 %v1795_v28, %v2513_v38  ;;  %v591_v41 = vand.u32 2147483648, %v2513_v38  ;;  %v1472_v39 = vmul.f32 1.1111112, %v945_v53 }
 0x141   : > { %v488_v33 = vsel %vm2553_vm7, %v487_v25, %v483_v18  ;;  %v1409_v29 = vshrl.u32 %v1377_v31, 8  ;;  %v559_v26 = vand.u32 2147483647, %v2543_v1  ;;  %v1470_v11 = vmul.f32 1.1111112, %v943_v36  ;;  %v2642_v18 = vpop.xlane.xlu2 %414 }
 0x142   : > { %v941_v51 = vmul.f32 %v2255_v49, %v488_v33  ;;  %v582_v43 = vsub.f32 1.0, %v581_v23  ;;  %vm586_vm10 = vweird.f32 %v1795_v28  ;;  %v1504_v47 = vsel %vm2521_vm0, %v1472_v39, 0.0 }
 0x143   : > { %v1797_v20 = vpop.eup %1796  ;;  %vm2595_vm11 = vcmp.ge.s32.totalorder %v1411_v32, 1677722  ;;  %v561_v12 = vand.u32 2147483648, %v2543_v1  ;;  %v3304_v44 = vmul.u32 2221713035, %v2446_v54  ;;  %1798 = vrcp.f32 %v2587_v63  ;;  %1536 = vst [vmem:[%s2560_s23 + $0x28] sm:$0xff] %v1504_v47  ;;  %vm2612_vm12 = vmor %vm585_vm9, %vm586_vm10 }
 0x144   : > { %v1502_v49 = vsel %vm2530_vm1, %v1470_v11, 0.0  ;;  %v1468_v50 = vmul.f32 1.1111112, %v941_v51  ;;  %v583_v24 = vmul.f32 %v1795_v28, %v582_v43  ;;  %v551_v34 = vmul.f32 %v1797_v20, %v2543_v1 }
 0x145   : > { %v1375_v2 = vxor.u32 %v1343_v9, %v3304_v44  ;;  %1534 = vst [vmem:[%s2560_s23 + $0x18] sm:$0xff] %v1502_v49  ;;  %vm2616_vm13 = vcmp.eq.f32.partialorder %v589_v58, 8.507059e+37  ;;  %v592_v40 = vor.u32 1.1754944e-38, %v591_v41  ;;  %vm555_vm14 = vweird.f32 %v2543_v1 }
 0x146   : > { %vm2621_vm15 = vcmp.eq.f32.partialorder %v559_v26, 8.507059e+37  ;;  %v1500_v55 = vsel %vm2549_vm5, %v1468_v50, 0.0  ;;  %v584_v25 = vadd.f32 %v1795_v28, %v583_v24  ;;  %v552_v38 = vsub.f32 1.0, %v551_v34  ;;  %v2719_v34 = vpop.xlane.xlu1 %424 }
 0x147   : > { %v529_v14 = vand.u32 2147483647, %v2587_v63  ;;  %1532 = vst [vmem:[%s2560_s23 + $0x8] sm:$0xff] %v1500_v55  ;;  %vm2629_vm0 = vcmp.ge.s32.totalorder %v1409_v29, 1677722  ;;  %vm556_vm1 = vweird.f32 %v1797_v20  ;;  %v531_v8 = vand.u32 2147483648, %v2587_v63 }
 0x148   : > { %v1126_v46 = vxor.u32 %v2377_v48, %v1084_v42  ;;  %1800 = vrcp.f32 %v2607_v17  ;;  %v588_v5 = vsel %vm2612_vm12, %v1795_v28, %v584_v25  ;;  %v553_v21 = vmul.f32 %v1797_v20, %v552_v38  ;;  %vm557_vm7 = vmor %vm555_vm14, %vm556_vm1 }
 0x149   : > { %v562_v32 = vor.u32 1.1754944e-38, %v561_v12  ;;  %v1407_v53 = vshrl.u32 %v1375_v2, 8  ;;  %v1799_v59 = vpop.eup %1798  ;;  %v593_v58 = vsel %vm2616_vm13, %v592_v40, %v588_v5  ;;  %vm525_vm2 = vweird.f32 %v2587_v63 }
 0x14a   : > { %v1158_v36 = vshrl.u32 %v1126_v46, 16  ;;  %vm630_vm3 = vweird.f32 %v2607_v17  ;;  %v948_v42 = vmul.f32 %v2264_v57, %v593_v58  ;;  %v554_v23 = vadd.f32 %v1797_v20, %v553_v21 }
 0x14b   : > { %v521_v41 = vmul.f32 %v1799_v59, %v2587_v63  ;;  %vm2646_vm5 = vcmp.eq.f32.partialorder %v529_v14, 8.507059e+37  ;;  %v532_v39 = vor.u32 1.1754944e-38, %v531_v8  ;;  %vm526_vm4 = vweird.f32 %v1799_v59 }
 0x14c   : > { %v1190_v33 = vxor.u32 %v1158_v36, %v1126_v46  ;;  %v634_v29 = vand.u32 2147483647, %v2607_v17  ;;  %v1050_v26 = vmul.u32 128, %v2467_v7  ;;  %v1475_v57 = vmul.f32 1.1111112, %v948_v42  ;;  %vm527_vm10 = vmor %vm525_vm2, %vm526_vm4 }
 0x14d   : > { %v558_v11 = vsel %vm557_vm7, %v1797_v20, %v554_v23  ;;  %v522_v51 = vsub.f32 1.0, %v521_v41  ;;  %1802 = vrcp.f32 %v2642_v18  ;;  %vm2658_vm8 = vcmp.ge.s32.totalorder %v1407_v53, 1677722  ;;  %v2693_v53 = vpop.xlane.xlu0 %410 }
 0x14e   : > { %v1801_v43 = vpop.eup %1800  ;;  %v563_v47 = vsel %vm2621_vm15, %v562_v32, %v558_v11  ;;  %v1222_v1 = vmul.u32 2146121005, %v1190_v33  ;;  %v636_v44 = vand.u32 2147483648, %v2607_v17  ;;  %v1082_v2 = vadd.s32 %v1050_v26, %v2368_v0 }
 0x14f   : > { %v1507_v7 = vsel %vm2595_vm11, %v1475_v57, 0.0  ;;  %v946_v20 = vmul.f32 %v2266_v62, %v563_v47  ;;  %v523_v49 = vmul.f32 %v1799_v59, %v522_v51  ;;  %v626_v50 = vmul.f32 %v1801_v43, %v2607_v17 }
 0x150   : > { %1539 = vst [vmem:[%s2560_s23 + $0x40] sm:$0xff] %v1507_v7  ;;  %v1254_v24 = vshrl.u32 %v1222_v1, 15  ;;  %vm631_vm6 = vweird.f32 %v1801_v43  ;;  %vm2669_vm9 = vcmp.eq.f32.partialorder %v634_v29, 8.507059e+37  ;;  %v1124_v30 = vxor.u32 %v2377_v48, %v1082_v2 }
 0x151   : > { %v1473_v54 = vmul.f32 1.1111112, %v946_v20  ;;  %v524_v40 = vadd.f32 %v1799_v59, %v523_v49  ;;  %v627_v9 = vsub.f32 1.0, %v626_v50  ;;  %v604_v60 = vand.u32 2147483647, %v2642_v18  ;;  %vm2688_vm12 = vmor %vm630_vm3, %vm631_vm6 }
 0x152   : > { %v1286_v62 = vxor.u32 %v1254_v24, %v1222_v1  ;;  %v637_v55 = vor.u32 1.1754944e-38, %v636_v44  ;;  %v1156_v25 = vshrl.u32 %v1124_v30, 16  ;;  %v1048_v38 = vmul.u32 128, %v2482_v52 }
 0x153   : > { %v1803_v14 = vpop.eup %1802  ;;  %v1505_v8 = vsel %vm2629_vm0, %v1473_v54, 0.0  ;;  %v528_v46 = vsel %vm527_vm10, %v1799_v59, %v524_v40  ;;  %v628_v5 = vmul.f32 %v1801_v43, %v627_v9  ;;  %vm600_vm11 = vweird.f32 %v2642_v18 }
 0x154   : > { %1537 = vst [vmem:[%s2560_s23 + $0x30] sm:$0xff] %v1505_v8  ;;  %v533_v21 = vsel %vm2646_vm5, %v532_v39, %v528_v46  ;;  %v1318_v32 = vmul.u32 2221713035, %v1286_v62  ;;  %v1188_v52 = vxor.u32 %v1156_v25, %v1124_v30  ;;  %v596_v31 = vmul.f32 %v1803_v14, %v2642_v18  ;;  %v2732_v46 = vpop.xlane.xlu2 %420 }
 0x155   : > { %v944_v59 = vmul.f32 %v2261_v56, %v533_v21  ;;  %v629_v58 = vadd.f32 %v1801_v43, %v628_v5  ;;  %vm2696_vm13 = vcmp.eq.f32.partialorder %v604_v60, 8.507059e+37  ;;  %v606_v42 = vand.u32 2147483648, %v2642_v18 }
 0x156   : > { %v1350_v23 = vshrl.u32 %v1318_v32, 16  ;;  %v1220_v17 = vmul.u32 2146121005, %v1188_v52  ;;  %v597_v41 = vsub.f32 1.0, %v596_v31  ;;  %v1080_v28 = vadd.s32 %v1048_v38, %v2368_v0 }
 0x157   : > { %v1471_v39 = vmul.f32 1.1111112, %v944_v59  ;;  %v633_v33 = vsel %vm2688_vm12, %v1801_v43, %v629_v58  ;;  %vm601_vm14 = vweird.f32 %v1803_v14  ;;  %1804 = vrcp.f32 %v2693_v53 }
 0x158   : > { %v1382_v56 = vxor.u32 %v1350_v23, %v1318_v32  ;;  %v638_v29 = vsel %vm2669_vm9, %v637_v55, %v633_v33  ;;  %v1252_v26 = vshrl.u32 %v1220_v17, 15  ;;  %v598_v57 = vmul.f32 %v1803_v14, %v597_v41  ;;  %vm602_vm15 = vmor %vm600_vm11, %vm601_vm14 }
 0x159   : > { %v1503_v11 = vsel %vm2658_vm8, %v1471_v39, 0.0  ;;  %v951_v51 = vmul.f32 %v2276_v15, %v638_v29  ;;  %v607_v47 = vor.u32 1.1754944e-38, %v606_v42  ;;  %v1122_v1 = vxor.u32 %v2377_v48, %v1080_v28  ;;  %v2787_v28 = vpop.xlane.xlu1 %430 }
 0x15a   : > { %1535 = vst [vmem:[%s2560_s23 + $0x20] sm:$0xff] %v1503_v11  ;;  %v1414_v44 = vshrl.u32 %v1382_v56, 8  ;;  %v1284_v43 = vxor.u32 %v1252_v26, %v1220_v17  ;;  %v599_v2 = vadd.f32 %v1803_v14, %v598_v57  ;;  %v574_v7 = vand.u32 2147483647, %v2693_v53 }
 0x15b   : > { %v1478_v20 = vmul.f32 1.1111112, %v951_v51  ;;  %v1154_v49 = vshrl.u32 %v1122_v1, 16  ;;  %v576_v12 = vand.u32 2147483648, %v2693_v53  ;;  %v988_v15 = vadd.s32 112, %v2344_v37 }
 0x15c   : > { %vm1446_vm0 = vcmp.ge.s32.totalorder %v1414_v44, 1677722  ;;  %v1316_v50 = vmul.u32 2221713035, %v1284_v43  ;;  %v603_v24 = vsel %vm602_vm15, %v1803_v14, %v599_v2  ;;  %vm570_vm1 = vweird.f32 %v2693_v53 }
 0x15d   : > { %v1805_v30 = vpop.eup %1804  ;;  %v1510_v54 = vsel %vm1446_vm0, %v1478_v20, 0.0  ;;  %v608_v40 = vsel %vm2696_vm13, %v607_v47, %v603_v24  ;;  %v1186_v9 = vxor.u32 %v1154_v49, %v1122_v1  ;;  %v1021_v18 = vadd.s32 %v2354_v35, %v988_v15 }
 0x15e   : > { %1542 = vst [vmem:[%s2560_s23 + $0x58] sm:$0xff] %v1510_v54  ;;  %v1348_v60 = vshrl.u32 %v1316_v50, 16  ;;  %v949_v62 = vmul.f32 %v2278_v19, %v608_v40  ;;  %v566_v55 = vmul.f32 %v1805_v30, %v2693_v53  ;;  %vm2727_vm2 = vcmp.eq.f32.partialorder %v574_v7, 8.507059e+37 }
 0x15f   : > { %v1218_v38 = vmul.u32 2146121005, %v1186_v9  ;;  %v577_v14 = vor.u32 1.1754944e-38, %v576_v12  ;;  %v1055_v8 = vmul.u32 128, %v1021_v18  ;;  %1806 = vrcp.f32 %v2719_v34 }
 0x160   : > { %v1380_v5 = vxor.u32 %v1348_v60, %v1316_v50  ;;  %v1476_v21 = vmul.f32 1.1111112, %v949_v62  ;;  %v567_v32 = vsub.f32 1.0, %v566_v55  ;;  %v679_v63 = vand.u32 2147483647, %v2719_v34 }
 0x161   : > { %v1250_v52 = vshrl.u32 %v1218_v38, 15  ;;  %v1087_v19 = vadd.s32 %v1055_v8, %v2368_v0  ;;  %v681_v31 = vand.u32 2147483648, %v2719_v34  ;;  %v986_v59 = vadd.s32 96, %v2344_v37 }
 0x162   : > { %v1412_v58 = vshrl.u32 %v1380_v5, 8  ;;  %v568_v36 = vmul.f32 %v1805_v30, %v567_v32  ;;  %vm571_vm3 = vweird.f32 %v1805_v30  ;;  %1808 = vrcp.f32 %v2732_v46 }
 0x163   : > { %v1282_v42 = vxor.u32 %v1250_v52, %v1218_v38  ;;  %v1129_v23 = vxor.u32 %v2377_v48, %v1087_v19  ;;  %vm675_vm5 = vweird.f32 %v2719_v34  ;;  %v1019_v17 = vadd.s32 %v2354_v35, %v986_v59  ;;  %vm572_vm8 = vmor %vm570_vm1, %vm571_vm3 }
 0x164   : > { %vm1444_vm7 = vcmp.ge.s32.totalorder %v1412_v58, 1677722  ;;  %v569_v41 = vadd.f32 %v1805_v30, %v568_v36  ;;  %vm2742_vm4 = vcmp.eq.f32.partialorder %v679_v63, 8.507059e+37  ;;  %v682_v39 = vor.u32 1.1754944e-38, %v681_v31 }
 0x165   : > { %v1807_v33 = vpop.eup %1806  ;;  %v1508_v56 = vsel %vm1444_vm7, %v1476_v21, 0.0  ;;  %v1314_v29 = vmul.u32 2221713035, %v1282_v42  ;;  %v1161_v26 = vshrl.u32 %v1129_v23, 16  ;;  %v1053_v57 = vmul.u32 128, %v1019_v17 }
 0x166   : > { %1540 = vst [vmem:[%s2560_s23 + $0x48] sm:$0xff] %v1508_v56  ;;  %v573_v11 = vsel %vm572_vm8, %v1805_v30, %v569_v41  ;;  %v671_v51 = vmul.f32 %v1807_v33, %v2719_v34  ;;  %vm645_vm6 = vweird.f32 %v2732_v46  ;;  %v649_v47 = vand.u32 2147483647, %v2732_v46  ;;  %v2759_v30 = vpop.xlane.xlu0 %416 }
 0x167   : > { %v1346_v1 = vshrl.u32 %v1314_v29, 16  ;;  %v578_v44 = vsel %vm2727_vm2, %v577_v14, %v573_v11  ;;  %v1193_v43 = vxor.u32 %v1161_v26, %v1129_v23  ;;  %v1085_v2 = vadd.s32 %v1053_v57, %v2368_v0 }
 0x168   : > { %v1809_v7 = vpop.eup %1808  ;;  %v947_v53 = vmul.f32 %v2273_v13, %v578_v44  ;;  %v672_v20 = vsub.f32 1.0, %v671_v51  ;;  %vm676_vm9 = vweird.f32 %v1807_v33  ;;  %v984_v49 = vadd.s32 80, %v2344_v37 }
 0x169   : > { %v1378_v12 = vxor.u32 %v1346_v1, %v1314_v29  ;;  %v1225_v15 = vmul.u32 2146121005, %v1193_v43  ;;  %v1127_v50 = vxor.u32 %v2377_v48, %v1085_v2  ;;  %v641_v24 = vmul.f32 %v1809_v7, %v2732_v46  ;;  %vm2768_vm11 = vmor %vm675_vm5, %vm676_vm9 }
 0x16a   : > { %v1474_v54 = vmul.f32 1.1111112, %v947_v53  ;;  %v673_v40 = vmul.f32 %v1807_v33, %v672_v20  ;;  %vm2761_vm10 = vcmp.eq.f32.partialorder %v649_v47, 8.507059e+37  ;;  %v651_v13 = vand.u32 2147483648, %v2732_v46 }
 0x16b   : > { %v1410_v18 = vshrl.u32 %v1378_v12, 8  ;;  %v1257_v60 = vshrl.u32 %v1225_v15, 15  ;;  %v1159_v55 = vshrl.u32 %v1127_v50, 16  ;;  %v642_v25 = vsub.f32 1.0, %v641_v24 }
 0x16c   : > { %v674_v38 = vadd.f32 %v1807_v33, %v673_v40  ;;  %vm646_vm12 = vweird.f32 %v1809_v7  ;;  %v1017_v14 = vadd.s32 %v2354_v35, %v984_v49  ;;  %1810 = vrcp.f32 %v2759_v30 }
 0x16d   : > { %vm1442_vm13 = vcmp.ge.s32.totalorder %v1410_v18, 1677722  ;;  %v1289_v8 = vxor.u32 %v1257_v60, %v1225_v15  ;;  %v1191_v5 = vxor.u32 %v1159_v55, %v1127_v50  ;;  %v643_v21 = vmul.f32 %v1809_v7, %v642_v25  ;;  %vm647_vm14 = vmor %vm645_vm6, %vm646_vm12 }
 0x16e   : > { %v1506_v32 = vsel %vm1442_vm13, %v1474_v54, 0.0  ;;  %v678_v34 = vsel %vm2768_vm11, %v1807_v33, %v674_v38  ;;  %v1051_v63 = vmul.u32 128, %v1017_v14  ;;  %v619_v52 = vand.u32 2147483647, %v2759_v30  ;;  %v2802_v54 = vpop.xlane.xlu2 %426 }
 0x16f   : > { %1538 = vst [vmem:[%s2560_s23 + $0x38] sm:$0xff] %v1506_v32  ;;  %v1321_v19 = vmul.u32 2221713035, %v1289_v8  ;;  %v683_v31 = vsel %vm2742_vm4, %v682_v39, %v678_v34  ;;  %v1223_v59 = vmul.u32 2146121005, %v1191_v5  ;;  %v644_v58 = vadd.f32 %v1809_v7, %v643_v21 }
 0x170   : > { %v954_v36 = vmul.f32 %v2288_v6, %v683_v31  ;;  %v652_v42 = vor.u32 1.1754944e-38, %v651_v13  ;;  %v1083_v23 = vadd.s32 %v1051_v63, %v2368_v0  ;;  %v621_v17 = vand.u32 2147483648, %v2759_v30 }
 0x171   : > { %v1353_v41 = vshrl.u32 %v1321_v19, 16  ;;  %v1255_v33 = vshrl.u32 %v1223_v59, 15  ;;  %v648_v56 = vsel %vm647_vm14, %v1809_v7, %v644_v58  ;;  %v991_v29 = vadd.s32 136, %v2344_v37 }
 0x172   : > { %v1811_v39 = vpop.eup %1810  ;;  %v653_v6 = vsel %vm2761_vm10, %v652_v42, %v648_v56  ;;  %v1125_v26 = vxor.u32 %v2377_v48, %v1083_v23  ;;  %vm615_vm15 = vweird.f32 %v2759_v30  ;;  %vm2795_vm0 = vcmp.eq.f32.partialorder %v619_v52, 8.507059e+37 }
 0x173   : > { %v1385_v46 = vxor.u32 %v1353_v41, %v1321_v19  ;;  %v1287_v57 = vxor.u32 %v1255_v33, %v1223_v59  ;;  %v952_v11 = vmul.f32 %v2290_v10, %v653_v6  ;;  %v611_v51 = vmul.f32 %v1811_v39, %v2759_v30 }
 0x174   : > { %v1481_v1 = vmul.f32 1.1111112, %v954_v36  ;;  %v1157_v44 = vshrl.u32 %v1125_v26, 16  ;;  %v1024_v43 = vadd.s32 %v2354_v35, %v991_v29  ;;  %1812 = vrcp.f32 %v2787_v28 }
 0x175   : > { %v1417_v2 = vshrl.u32 %v1385_v46, 8  ;;  %v1319_v7 = vmul.u32 2221713035, %v1287_v57  ;;  %v612_v53 = vsub.f32 1.0, %v611_v51  ;;  %v622_v20 = vor.u32 1.1754944e-38, %v621_v17  ;;  %v2835_v46 = vpop.xlane.xlu0 %422 }
 0x176   : > { %v1189_v49 = vxor.u32 %v1157_v44, %v1125_v26  ;;  %vm616_vm1 = vweird.f32 %v1811_v39  ;;  %v1058_v10 = vmul.u32 128, %v1024_v43  ;;  %v724_v12 = vand.u32 2147483647, %v2787_v28 }
 0x177   : > { %vm1449_vm2 = vcmp.ge.s32.totalorder %v1417_v2, 1677722  ;;  %v1351_v15 = vshrl.u32 %v1319_v7, 16  ;;  %v1479_v50 = vmul.f32 1.1111112, %v952_v11  ;;  %v613_v24 = vmul.f32 %v1811_v39, %v612_v53  ;;  %vm617_vm5 = vmor %vm615_vm15, %vm616_vm1 }
 0x178   : > { %v1513_v40 = vsel %vm1449_vm2, %v1481_v1, 0.0  ;;  %v1221_v9 = vmul.u32 2146121005, %v1189_v49  ;;  %v1090_v13 = vadd.s32 %v1058_v10, %v2368_v0  ;;  %vm720_vm3 = vweird.f32 %v2787_v28 }
 0x179   : > { %1545 = vst [vmem:[%s2560_s23 + $0x70] sm:$0xff] %v1513_v40  ;;  %v1383_v18 = vxor.u32 %v1351_v15, %v1319_v7  ;;  %v614_v60 = vadd.f32 %v1811_v39, %v613_v24  ;;  %v726_v62 = vand.u32 2147483648, %v2787_v28  ;;  %v989_v55 = vadd.s32 120, %v2344_v37 }
 0x17a   : > { %v1813_v25 = vpop.eup %1812  ;;  %v1253_v38 = vshrl.u32 %v1221_v9, 15  ;;  %v1132_v14 = vxor.u32 %v2377_v48, %v1090_v13  ;;  %vm2813_vm7 = vcmp.eq.f32.partialorder %v724_v12, 8.507059e+37  ;;  %1814 = vrcp.f32 %v2802_v54 }
 0x17b   : > { %v1415_v5 = vshrl.u32 %v1383_v18, 8  ;;  %v618_v21 = vsel %vm617_vm5, %v1811_v39, %v614_v60  ;;  %v716_v32 = vmul.f32 %v1813_v25, %v2787_v28  ;;  %vm721_vm4 = vweird.f32 %v1813_v25  ;;  %v2852_v18 = vpop.xlane.xlu1 %436 }
 0x17c   : > { %v1285_v34 = vxor.u32 %v1253_v38, %v1221_v9  ;;  %v623_v63 = vsel %vm2795_vm0, %v622_v20, %v618_v21  ;;  %v1164_v30 = vshrl.u32 %v1132_v14, 16  ;;  %v1022_v52 = vadd.s32 %v2354_v35, %v989_v55  ;;  %vm2829_vm9 = vmor %vm720_vm3, %vm721_vm4 }
 0x17d   : > { %vm1447_vm8 = vcmp.ge.s32.totalorder %v1415_v5, 1677722  ;;  %v950_v19 = vmul.f32 %v2285_v27, %v623_v63  ;;  %v717_v31 = vsub.f32 1.0, %v716_v32  ;;  %v694_v59 = vand.u32 2147483647, %v2802_v54 }
 0x17e   : > { %v1511_v58 = vsel %vm1447_vm8, %v1479_v50, 0.0  ;;  %v1317_v36 = vmul.u32 2221713035, %v1285_v34  ;;  %v1196_v42 = vxor.u32 %v1164_v30, %v1132_v14  ;;  %v1056_v23 = vmul.u32 128, %v1022_v52 }
 0x17f   : > { %1543 = vst [vmem:[%s2560_s23 + $0x60] sm:$0xff] %v1511_v58  ;;  %v1477_v17 = vmul.f32 1.1111112, %v950_v19  ;;  %v718_v41 = vmul.f32 %v1813_v25, %v717_v31  ;;  %v727_v33 = vor.u32 1.1754944e-38, %v726_v62  ;;  %vm690_vm6 = vweird.f32 %v2802_v54 }
 0x180   : > { %v1815_v56 = vpop.eup %1814  ;;  %v1349_v29 = vshrl.u32 %v1317_v36, 16  ;;  %v1228_v39 = vmul.u32 2146121005, %v1196_v42  ;;  %v1088_v6 = vadd.s32 %v1056_v23, %v2368_v0  ;;  %v987_v26 = vadd.s32 104, %v2344_v37 }
 0x181   : > { %v719_v57 = vadd.f32 %v1813_v25, %v718_v41  ;;  %v686_v11 = vmul.f32 %v1815_v56, %v2802_v54  ;;  %vm2838_vm10 = vcmp.eq.f32.partialorder %v694_v59, 8.507059e+37  ;;  %v696_v47 = vand.u32 2147483648, %v2802_v54 }
 0x182   : > { %v1381_v28 = vxor.u32 %v1349_v29, %v1317_v36  ;;  %v1260_v1 = vshrl.u32 %v1228_v39, 15  ;;  %v1130_v44 = vxor.u32 %v2377_v48, %v1088_v6  ;;  %v1020_v43 = vadd.s32 %v2354_v35, %v987_v26 }
 0x183   : > { %v723_v2 = vsel %vm2829_vm9, %v1813_v25, %v719_v57  ;;  %v687_v7 = vsub.f32 1.0, %v686_v11  ;;  %vm691_vm11 = vweird.f32 %v1815_v56  ;;  %1816 = vrcp.f32 %v2835_v46  ;;  %v2876_v57 = vpop.xlane.xlu2 %432 }
 0x184   : > { %v1413_v53 = vshrl.u32 %v1381_v28, 8  ;;  %v1292_v20 = vxor.u32 %v1260_v1, %v1228_v39  ;;  %v728_v49 = vsel %vm2813_vm7, %v727_v33, %v723_v2  ;;  %v1162_v10 = vshrl.u32 %v1130_v44, 16  ;;  %vm692_vm13 = vmor %vm690_vm6, %vm691_vm11 }
 0x185   : > { %v957_v12 = vmul.f32 %v2300_v45, %v728_v49  ;;  %v688_v15 = vmul.f32 %v1815_v56, %v687_v7  ;;  %v697_v50 = vor.u32 1.1754944e-38, %v696_v47  ;;  %v1054_v24 = vmul.u32 128, %v1020_v43 }
 0x186   : > { %vm1445_vm12 = vcmp.ge.s32.totalorder %v1413_v53, 1677722  ;;  %v1324_v40 = vmul.u32 2221713035, %v1292_v20  ;;  %v1194_v9 = vxor.u32 %v1162_v10, %v1130_v44  ;;  %v664_v13 = vand.u32 2147483647, %v2835_v46 }
 0x187   : > { %v1509_v60 = vsel %vm1445_vm12, %v1477_v17, 0.0  ;;  %v689_v62 = vadd.f32 %v1815_v56, %v688_v15  ;;  %v1086_v55 = vadd.s32 %v1054_v24, %v2368_v0  ;;  %v666_v25 = vand.u32 2147483648, %v2835_v46 }
 0x188   : > { %1541 = vst [vmem:[%s2560_s23 + $0x50] sm:$0xff] %v1509_v60  ;;  %v1356_v38 = vshrl.u32 %v1324_v40, 16  ;;  %v1484_v14 = vmul.f32 1.1111112, %v957_v12  ;;  %v1226_v45 = vmul.u32 2146121005, %v1194_v9  ;;  %vm660_vm14 = vweird.f32 %v2835_v46 }
 0x189   : > { %v1817_v8 = vpop.eup %1816  ;;  %v693_v5 = vsel %vm692_vm13, %v1815_v56, %v689_v62  ;;  %v1128_v21 = vxor.u32 %v2377_v48, %v1086_v55  ;;  %v994_v32 = vadd.s32 160, %v2344_v37  ;;  %1818 = vrcp.f32 %v2852_v18 }
 0x18a   : > { %v1388_v34 = vxor.u32 %v1356_v38, %v1324_v40  ;;  %v1258_v63 = vshrl.u32 %v1226_v45, 15  ;;  %v698_v30 = vsel %vm2838_vm10, %v697_v50, %v693_v5  ;;  %v656_v52 = vmul.f32 %v1817_v8, %v2835_v46 }
 0x18b   : > { %v955_v54 = vmul.f32 %v2302_v16, %v698_v30  ;;  %v1160_v19 = vshrl.u32 %v1128_v21, 16  ;;  %vm2868_vm15 = vcmp.eq.f32.partialorder %v664_v13, 8.507059e+37  ;;  %v1027_v59 = vadd.s32 %v2354_v35, %v994_v32 }
 0x18c   : > { %v1420_v58 = vshrl.u32 %v1388_v34, 8  ;;  %v1290_v36 = vxor.u32 %v1258_v63, %v1226_v45  ;;  %v657_v42 = vsub.f32 1.0, %v656_v52  ;;  %v667_v23 = vor.u32 1.1754944e-38, %v666_v25 }
 0x18d   : > { %v1192_v17 = vxor.u32 %v1160_v19, %v1128_v21  ;;  %vm661_vm0 = vweird.f32 %v1817_v8  ;;  %v1061_v41 = vmul.u32 128, %v1027_v59  ;;  %vm765_vm1 = vweird.f32 %v2852_v18  ;;  %v2905_v21 = vpop.xlane.xlu0 %428 }
 0x18e   : > { %vm1452_vm2 = vcmp.ge.s32.totalorder %v1420_v58, 1677722  ;;  %v1322_v33 = vmul.u32 2221713035, %v1290_v36  ;;  %v1482_v16 = vmul.f32 1.1111112, %v955_v54  ;;  %v658_v56 = vmul.f32 %v1817_v8, %v657_v42  ;;  %vm662_vm3 = vmor %vm660_vm14, %vm661_vm0 }
 0x18f   : > { %v1819_v29 = vpop.eup %1818  ;;  %v1516_v39 = vsel %vm1452_vm2, %v1484_v14, 0.0  ;;  %v1224_v27 = vmul.u32 2146121005, %v1192_v17  ;;  %v1093_v6 = vadd.s32 %v1061_v41, %v2368_v0  ;;  %v769_v26 = vand.u32 2147483647, %v2852_v18 }
 0x190   : > { %1548 = vst [vmem:[%s2560_s23 + $0x88] sm:$0xff] %v1516_v39  ;;  %v1354_v11 = vshrl.u32 %v1322_v33, 16  ;;  %v659_v51 = vadd.f32 %v1817_v8, %v658_v56  ;;  %v761_v47 = vmul.f32 %v1819_v29, %v2852_v18  ;;  %v771_v28 = vand.u32 2147483648, %v2852_v18 }
 0x191   : > { %v1256_v1 = vshrl.u32 %v1224_v27, 15  ;;  %v1135_v44 = vxor.u32 %v2377_v48, %v1093_v6  ;;  %vm766_vm5 = vweird.f32 %v1819_v29  ;;  %v992_v43 = vadd.s32 144, %v2344_v37 }
 0x192   : > { %v1386_v2 = vxor.u32 %v1354_v11, %v1322_v33  ;;  %v663_v7 = vsel %vm662_vm3, %v1817_v8, %v659_v51  ;;  %v762_v53 = vsub.f32 1.0, %v761_v47  ;;  %1820 = vrcp.f32 %v2876_v57  ;;  %vm2894_vm7 = vmor %vm765_vm1, %vm766_vm5 }
 0x193   : > { %v1288_v20 = vxor.u32 %v1256_v1, %v1224_v27  ;;  %v668_v49 = vsel %vm2868_vm15, %v667_v23, %v663_v7  ;;  %v1167_v10 = vshrl.u32 %v1135_v44, 16  ;;  %v1025_v12 = vadd.s32 %v2354_v35, %v992_v43 }
 0x194   : > { %v1418_v15 = vshrl.u32 %v1386_v2, 8  ;;  %v953_v46 = vmul.f32 %v2297_v4, %v668_v49  ;;  %v763_v50 = vmul.f32 %v1819_v29, %v762_v53  ;;  %v772_v13 = vor.u32 1.1754944e-38, %v771_v28 }
 0x195   : > { %v1320_v24 = vmul.u32 2221713035, %v1288_v20  ;;  %v1199_v40 = vxor.u32 %v1167_v10, %v1135_v44  ;;  %v1059_v60 = vmul.u32 128, %v1025_v12  ;;  %vm770_vm8 = vcmp.eq.f32.partialorder %v769_v26, 8.507059e+37 }
 0x196   : > { %vm1450_vm4 = vcmp.ge.s32.totalorder %v1418_v15, 1677722  ;;  %v764_v62 = vadd.f32 %v1819_v29, %v763_v50  ;;  %vm735_vm6 = vweird.f32 %v2876_v57  ;;  %v1480_v45 = vmul.f32 1.1111112, %v953_v46 }
 0x197   : > { %v1514_v55 = vsel %vm1450_vm4, %v1482_v16, 0.0  ;;  %v1352_v4 = vshrl.u32 %v1320_v24, 16  ;;  %v1231_v25 = vmul.u32 2146121005, %v1199_v40  ;;  %v1091_v38 = vadd.s32 %v1059_v60, %v2368_v0  ;;  %v2917_v16 = vpop.xlane.xlu1 %442 }
 0x198   : > { %v1821_v14 = vpop.eup %1820  ;;  %1546 = vst [vmem:[%s2560_s23 + $0x78] sm:$0xff] %v1514_v55  ;;  %v768_v18 = vsel %vm2894_vm7, %v1819_v29, %v764_v62  ;;  %v739_v8 = vand.u32 2147483647, %v2876_v57  ;;  %v990_v5 = vadd.s32 128, %v2344_v37  ;;  %v741_v19 = vand.u32 2147483648, %v2876_v57 }
 0x199   : > { %v1384_v32 = vxor.u32 %v1352_v4, %v1320_v24  ;;  %v1263_v34 = vshrl.u32 %v1231_v25, 15  ;;  %v773_v63 = vsel %vm770_vm8, %v772_v13, %v768_v18  ;;  %v1133_v30 = vxor.u32 %v2377_v48, %v1091_v38 }
 0x19a   : > { %v960_v52 = vmul.f32 %v2312_v3, %v773_v63  ;;  %v731_v54 = vmul.f32 %v1821_v14, %v2876_v57  ;;  %v1023_v31 = vadd.s32 %v2354_v35, %v990_v5  ;;  %1822 = vrcp.f32 %v2905_v21 }
 0x19b   : > { %v1416_v59 = vshrl.u32 %v1384_v32, 8  ;;  %v1295_v58 = vxor.u32 %v1263_v34, %v1231_v25  ;;  %v1165_v36 = vshrl.u32 %v1133_v30, 16  ;;  %vm736_vm9 = vweird.f32 %v1821_v14 }
 0x19c   : > { %v732_v42 = vsub.f32 1.0, %v731_v54  ;;  %vm2913_vm10 = vcmp.eq.f32.partialorder %v739_v8, 8.507059e+37  ;;  %v1057_v17 = vmul.u32 128, %v1023_v31  ;;  %v1487_v41 = vmul.f32 1.1111112, %v960_v52  ;;  %vm737_vm12 = vmor %vm735_vm6, %vm736_vm9  ;;  %v2945_v8 = vpop.xlane.xlu2 %438 }
 0x19d   : > { %vm1448_vm11 = vcmp.ge.s32.totalorder %v1416_v59, 1677722  ;;  %v1327_v3 = vmul.u32 2221713035, %v1295_v58  ;;  %v1197_v33 = vxor.u32 %v1165_v36, %v1133_v30  ;;  %v709_v27 = vand.u32 2147483647, %v2905_v21 }
 0x19e   : > { %v1512_v56 = vsel %vm1448_vm11, %v1480_v45, 0.0  ;;  %v733_v29 = vmul.f32 %v1821_v14, %v732_v42  ;;  %v1089_v39 = vadd.s32 %v1057_v17, %v2368_v0  ;;  %v742_v11 = vor.u32 1.1754944e-38, %v741_v19 }
 0x19f   : > { %1544 = vst [vmem:[%s2560_s23 + $0x68] sm:$0xff] %v1512_v56  ;;  %v1359_v6 = vshrl.u32 %v1327_v3, 16  ;;  %v1229_v26 = vmul.u32 2146121005, %v1197_v33  ;;  %v997_v51 = vadd.s32 184, %v2344_v37  ;;  %v711_v1 = vand.u32 2147483648, %v2905_v21 }
 0x1a0   : > { %v734_v47 = vadd.f32 %v1821_v14, %v733_v29  ;;  %v1131_v28 = vxor.u32 %v2377_v48, %v1089_v39  ;;  %1824 = vrcp.f32 %v2917_v16  ;;  %v1823_v44 = vpop.eup %1822  ;;  %vm705_vm13 = vweird.f32 %v2905_v21 }
 0x1a1   : > { %v1391_v43 = vxor.u32 %v1359_v6, %v1327_v3  ;;  %v1261_v2 = vshrl.u32 %v1229_v26, 15  ;;  %v1030_v7 = vadd.s32 %v2354_v35, %v997_v51  ;;  %v701_v49 = vmul.f32 %v1823_v44, %v2905_v21 }
 0x1a2   : > { %v738_v53 = vsel %vm737_vm12, %v1821_v14, %v734_v47  ;;  %v1163_v20 = vshrl.u32 %v1131_v28, 16  ;;  %vm2932_vm14 = vcmp.eq.f32.partialorder %v709_v27, 8.507059e+37  ;;  %v712_v40 = vor.u32 1.1754944e-38, %v711_v1  ;;  %v2974_v47 = vpop.xlane.xlu0 %434 }
 0x1a3   : > { %v1423_v12 = vshrl.u32 %v1391_v43, 8  ;;  %v1293_v15 = vxor.u32 %v1261_v2, %v1229_v26  ;;  %v743_v46 = vsel %vm2913_vm10, %v742_v11, %v738_v53  ;;  %v1064_v57 = vmul.u32 128, %v1030_v7  ;;  %v3351_v53 = vld [vmem:[#allocation11_spill] sm:$0xff] }
 0x1a4   : > { %v1195_v50 = vxor.u32 %v1163_v20, %v1131_v28  ;;  %v702_v24 = vsub.f32 1.0, %v701_v49  ;;  %vm810_vm15 = vweird.f32 %v2917_v16  ;;  %vm706_vm1 = vweird.f32 %v1823_v44 }
 0x1a5   : > { %vm1455_vm0 = vcmp.ge.s32.totalorder %v1423_v12, 1677722  ;;  %v1325_v9 = vmul.u32 2221713035, %v1293_v15  ;;  %v1096_v13 = vadd.s32 %v1064_v57, %v2368_v0  ;;  %v958_v55 = vmul.f32 %v2316_v22, %v743_v46  ;;  %vm707_vm3 = vmor %vm705_vm13, %vm706_vm1 }
 0x1a6   : > { %v1825_v60 = vpop.eup %1824  ;;  %v1519_v62 = vsel %vm1455_vm0, %v1487_v41, 0.0  ;;  %v1227_v4 = vmul.u32 2146121005, %v1195_v50  ;;  %v703_v25 = vmul.f32 %v1823_v44, %v702_v24  ;;  %v814_v18 = vand.u32 2147483647, %v2917_v16  ;;  %v3367_v50 = vld [vmem:[#allocation15_spill] sm:$0xff] }
 0x1a7   : > { %1551 = vst [vmem:[%s2560_s23 + $0xa0] sm:$0xff] %v1519_v62  ;;  %v1357_v38 = vshrl.u32 %v1325_v9, 16  ;;  %v1138_v14 = vxor.u32 %v2377_v48, %v1096_v13  ;;  %v806_v45 = vmul.f32 %v1825_v60, %v2917_v16  ;;  %vm811_vm2 = vweird.f32 %v1825_v60  ;;  %v2989_v13 = vpop.xlane.xlu1 %448 }
 0x1a8   : > { %v1259_v5 = vshrl.u32 %v1227_v4, 15  ;;  %v704_v32 = vadd.f32 %v1823_v44, %v703_v25  ;;  %v816_v34 = vand.u32 2147483648, %v2917_v16  ;;  %v995_v52 = vadd.s32 168, %v2344_v37  ;;  %vm2958_vm5 = vmor %vm810_vm15, %vm811_vm2 }
 0x1a9   : > { %v1389_v63 = vxor.u32 %v1357_v38, %v1325_v9  ;;  %v1170_v22 = vshrl.u32 %v1138_v14, 16  ;;  %v807_v30 = vsub.f32 1.0, %v806_v45  ;;  %v1485_v54 = vmul.f32 1.1111112, %v958_v55 }
 0x1aa   : > { %v1291_v19 = vxor.u32 %v1259_v5, %v1227_v4  ;;  %v708_v31 = vsel %vm707_vm3, %v1823_v44, %v704_v32  ;;  %1826 = vrcp.f32 %v2945_v8  ;;  %vm2962_vm7 = vcmp.eq.f32.partialorder %v814_v18, 8.507059e+37 }
 0x1ab   : > { %v1421_v59 = vshrl.u32 %v1389_v63, 8  ;;  %v713_v58 = vsel %vm2932_vm14, %v712_v40, %v708_v31  ;;  %v1202_v36 = vxor.u32 %v1170_v22, %v1138_v14  ;;  %v808_v42 = vmul.f32 %v1825_v60, %v807_v30 }
 0x1ac   : > { %v1323_v23 = vmul.u32 2221713035, %v1291_v19  ;;  %v817_v3 = vor.u32 1.1754944e-38, %v816_v34  ;;  %v1028_v41 = vadd.s32 %v2354_v35, %v995_v52  ;;  %v956_v33 = vmul.f32 %v2309_v61, %v713_v58 }
 0x1ad   : > { %vm1453_vm4 = vcmp.ge.s32.totalorder %v1421_v59, 1677722  ;;  %v1234_v56 = vmul.u32 2146121005, %v1202_v36  ;;  %v809_v29 = vadd.f32 %v1825_v60, %v808_v42  ;;  %vm780_vm8 = vweird.f32 %v2945_v8  ;;  %v3356_v42 = vld [vmem:[#allocation12_spill] sm:$0xff] }
 0x1ae   : > { %v1517_v39 = vsel %vm1453_vm4, %v1485_v54, 0.0  ;;  %v1355_v27 = vshrl.u32 %v1323_v23, 16  ;;  %v1062_v6 = vmul.u32 128, %v1028_v41  ;;  %v784_v11 = vand.u32 2147483647, %v2945_v8 }
 0x1af   : > { %1549 = vst [vmem:[%s2560_s23 + $0x90] sm:$0xff] %v1517_v39  ;;  %v1266_v16 = vshrl.u32 %v1234_v56, 15  ;;  %v813_v26 = vsel %vm2958_vm5, %v1825_v60, %v809_v29  ;;  %v786_v51 = vand.u32 2147483648, %v2945_v8  ;;  %v993_v43 = vadd.s32 152, %v2344_v37 }
 0x1b0   : > { %v1827_v28 = vpop.eup %1826  ;;  %v1387_v61 = vxor.u32 %v1355_v27, %v1323_v23  ;;  %v818_v1 = vsel %vm2962_vm7, %v817_v3, %v813_v26  ;;  %v1094_v44 = vadd.s32 %v1062_v6, %v2368_v0  ;;  %v1483_v2 = vmul.f32 1.1111112, %v956_v33 }
 0x1b1   : > { %v1298_v7 = vxor.u32 %v1266_v16, %v1234_v56  ;;  %v963_v20 = vmul.f32 %v3351_v53, %v818_v1  ;;  %v776_v49 = vmul.f32 %v1827_v28, %v2945_v8  ;;  %v1026_v15 = vadd.s32 %v2354_v35, %v993_v43 }
 0x1b2   : > { %v1419_v10 = vshrl.u32 %v1387_v61, 8  ;;  %v1136_v12 = vxor.u32 %v2377_v48, %v1094_v44  ;;  %1828 = vrcp.f32 %v2974_v47  ;;  %vm2985_vm6 = vcmp.eq.f32.partialorder %v784_v11, 8.507059e+37 }
 0x1b3   : > { %v1330_v46 = vmul.u32 2221713035, %v1298_v7  ;;  %v777_v57 = vsub.f32 1.0, %v776_v49  ;;  %v787_v24 = vor.u32 1.1754944e-38, %v786_v51  ;;  %vm781_vm10 = vweird.f32 %v1827_v28  ;;  %v3017_v51 = vpop.xlane.xlu2 %444 }
 0x1b4   : > { %vm1451_vm9 = vcmp.ge.s32.totalorder %v1419_v10, 1677722  ;;  %v1168_v40 = vshrl.u32 %v1136_v12, 16  ;;  %v1060_v9 = vmul.u32 128, %v1026_v15  ;;  %v754_v4 = vand.u32 2147483647, %v2974_v47  ;;  %vm782_vm11 = vmor %vm780_vm8, %vm781_vm10 }
 0x1b5   : > { %v1515_v60 = vsel %vm1451_vm9, %v1483_v2, 0.0  ;;  %v1362_v62 = vshrl.u32 %v1330_v46, 16  ;;  %v778_v55 = vmul.f32 %v1827_v28, %v777_v57  ;;  %v1490_v25 = vmul.f32 1.1111112, %v963_v20 }
 0x1b6   : > { %1547 = vst [vmem:[%s2560_s23 + $0x80] sm:$0xff] %v1515_v60  ;;  %v1200_v38 = vxor.u32 %v1168_v40, %v1136_v12  ;;  %v1092_v14 = vadd.s32 %v1060_v9, %v2368_v0  ;;  %v1000_v45 = vadd.s32 208, %v2344_v37  ;;  %v756_v32 = vand.u32 2147483648, %v2974_v47 }
 0x1b7   : > { %v1394_v18 = vxor.u32 %v1362_v62, %v1330_v46  ;;  %v779_v5 = vadd.f32 %v1827_v28, %v778_v55  ;;  %1830 = vrcp.f32 %v2989_v13  ;;  %vm750_vm12 = vweird.f32 %v2974_v47  ;;  %v3361_v55 = vld [vmem:[#allocation10_spill] sm:$0xff] }
 0x1b8   : > { %v1829_v34 = vpop.eup %1828  ;;  %v1232_v63 = vmul.u32 2146121005, %v1200_v38  ;;  %v1134_v22 = vxor.u32 %v2377_v48, %v1092_v14  ;;  %v1033_v30 = vadd.s32 %v2354_v35, %v1000_v45  ;;  %vm3004_vm13 = vcmp.eq.f32.partialorder %v754_v4, 8.507059e+37 }
 0x1b9   : > { %v1426_v52 = vshrl.u32 %v1394_v18, 8  ;;  %v783_v54 = vsel %vm782_vm11, %v1827_v28, %v779_v5  ;;  %v746_v19 = vmul.f32 %v1829_v34, %v2974_v47  ;;  %v757_v17 = vor.u32 1.1754944e-38, %v756_v32 }
 0x1ba   : > { %v1264_v59 = vshrl.u32 %v1232_v63, 15  ;;  %v788_v8 = vsel %vm2985_vm6, %v787_v24, %v783_v54  ;;  %v1166_v58 = vshrl.u32 %v1134_v22, 16  ;;  %v1067_v36 = vmul.u32 128, %v1033_v30  ;;  %v3046_v30 = vpop.xlane.xlu0 %440 }
 0x1bb   : > { %vm1458_vm14 = vcmp.ge.s32.totalorder %v1426_v52, 1677722  ;;  %v961_v23 = vmul.f32 %v3356_v42, %v788_v8  ;;  %v747_v21 = vsub.f32 1.0, %v746_v19  ;;  %vm751_vm15 = vweird.f32 %v1829_v34 }
 0x1bc   : > { %v1522_v3 = vsel %vm1458_vm14, %v1490_v25, 0.0  ;;  %v1296_v41 = vxor.u32 %v1264_v59, %v1232_v63  ;;  %v1198_v33 = vxor.u32 %v1166_v58, %v1134_v22  ;;  %v1099_v56 = vadd.s32 %v1067_v36, %v2368_v0  ;;  %vm752_vm1 = vmor %vm750_vm12, %vm751_vm15 }
 0x1bd   : > { %v1831_v29 = vpop.eup %1830  ;;  %1554 = vst [vmem:[%s2560_s23 + $0xb8] sm:$0xff] %v1522_v3  ;;  %v748_v39 = vmul.f32 %v1829_v34, %v747_v21  ;;  %vm855_vm0 = vweird.f32 %v2989_v13  ;;  %v859_v27 = vand.u32 2147483647, %v2989_v13  ;;  %v1488_v28 = vmul.f32 1.1111112, %v961_v23 }
 0x1be   : > { %v1328_v6 = vmul.u32 2221713035, %v1296_v41  ;;  %v1230_v16 = vmul.u32 2146121005, %v1198_v33  ;;  %v1141_v26 = vxor.u32 %v2377_v48, %v1099_v56  ;;  %v851_v11 = vmul.f32 %v1831_v29, %v2989_v13 }
 0x1bf   : > { %v749_v61 = vadd.f32 %v1829_v34, %v748_v39  ;;  %v861_v1 = vand.u32 2147483648, %v2989_v13  ;;  %v998_v44 = vadd.s32 192, %v2344_v37  ;;  %vm856_vm2 = vweird.f32 %v1831_v29 }
 0x1c0   : > { %v1360_v43 = vshrl.u32 %v1328_v6, 16  ;;  %v1262_v2 = vshrl.u32 %v1230_v16, 15  ;;  %v1173_v7 = vshrl.u32 %v1141_v26, 16  ;;  %v852_v53 = vsub.f32 1.0, %v851_v11  ;;  %vm3033_vm5 = vmor %vm855_vm0, %vm856_vm2 }
 0x1c1   : > { %v753_v20 = vsel %vm752_vm1, %v1829_v34, %v749_v61  ;;  %v1031_v49 = vadd.s32 %v2354_v35, %v998_v44  ;;  %1832 = vrcp.f32 %v3017_v51  ;;  %vm3027_vm3 = vcmp.eq.f32.partialorder %v859_v27, 8.507059e+37  ;;  %v3059_v27 = vpop.xlane.xlu1 %454 }
 0x1c2   : > { %v1392_v10 = vxor.u32 %v1360_v43, %v1328_v6  ;;  %v1294_v12 = vxor.u32 %v1262_v2, %v1230_v16  ;;  %v758_v15 = vsel %vm3004_vm13, %v757_v17, %v753_v20  ;;  %v1205_v46 = vxor.u32 %v1173_v7, %v1141_v26  ;;  %v3364_v17 = vld [vmem:[#allocation14_spill] sm:$0xff] }
 0x1c3   : > { %v853_v57 = vmul.f32 %v1831_v29, %v852_v53  ;;  %v862_v47 = vor.u32 1.1754944e-38, %v861_v1  ;;  %v1065_v24 = vmul.u32 128, %v1031_v49  ;;  %vm825_vm7 = vweird.f32 %v3017_v51 }
 0x1c4   : > { %v1424_v40 = vshrl.u32 %v1392_v10, 8  ;;  %v1326_v9 = vmul.u32 2221713035, %v1294_v12  ;;  %v1237_v60 = vmul.u32 2146121005, %v1205_v46  ;;  %v959_v4 = vmul.f32 %v3361_v55, %v758_v15 }
 0x1c5   : > { %v854_v25 = vadd.f32 %v1831_v29, %v853_v57  ;;  %v1097_v38 = vadd.s32 %v1065_v24, %v2368_v0  ;;  %v829_v14 = vand.u32 2147483647, %v3017_v51  ;;  %v831_v5 = vand.u32 2147483648, %v3017_v51 }
 0x1c6   : > { %vm1456_vm4 = vcmp.ge.s32.totalorder %v1424_v40, 1677722  ;;  %v1358_v45 = vshrl.u32 %v1326_v9, 16  ;;  %v1269_v18 = vshrl.u32 %v1237_v60, 15  ;;  %v996_v22 = vadd.s32 176, %v2344_v37 }
 0x1c7   : > { %v1833_v13 = vpop.eup %1832  ;;  %v1520_v32 = vsel %vm1456_vm4, %v1488_v28, 0.0  ;;  %v858_v34 = vsel %vm3033_vm5, %v1831_v29, %v854_v25  ;;  %v1139_v63 = vxor.u32 %v2377_v48, %v1097_v38  ;;  %v1486_v59 = vmul.f32 1.1111112, %v959_v4 }
 0x1c8   : > { %1552 = vst [vmem:[%s2560_s23 + $0xa8] sm:$0xff] %v1520_v32  ;;  %v1390_v52 = vxor.u32 %v1358_v45, %v1326_v9  ;;  %v1301_v54 = vxor.u32 %v1269_v18, %v1237_v60  ;;  %v863_v19 = vsel %vm3027_vm3, %v862_v47, %v858_v34  ;;  %v821_v31 = vmul.f32 %v1833_v13, %v3017_v51 }
 0x1c9   : > { %v1171_v8 = vshrl.u32 %v1139_v63, 16  ;;  %vm3052_vm8 = vcmp.eq.f32.partialorder %v829_v14, 8.507059e+37  ;;  %v1029_v36 = vadd.s32 %v2354_v35, %v996_v22  ;;  %1834 = vrcp.f32 %v3046_v30 }
 0x1ca   : > { %v1422_v42 = vshrl.u32 %v1390_v52, 8  ;;  %v1333_v23 = vmul.u32 2221713035, %v1301_v54  ;;  %v822_v21 = vsub.f32 1.0, %v821_v31  ;;  %v966_v3 = vmul.f32 %v3364_v17, %v863_v19 }
 0x1cb   : > { %v1203_v41 = vxor.u32 %v1171_v8, %v1139_v63  ;;  %v832_v33 = vor.u32 1.1754944e-38, %v831_v5  ;;  %v1063_v56 = vmul.u32 128, %v1029_v36  ;;  %vm826_vm9 = vweird.f32 %v1833_v13 }
 0x1cc   : > { %vm1454_vm6 = vcmp.ge.s32.totalorder %v1422_v42, 1677722  ;;  %v1365_v29 = vshrl.u32 %v1333_v23, 16  ;;  %v823_v39 = vmul.f32 %v1833_v13, %v822_v21  ;;  %v799_v11 = vand.u32 2147483647, %v3046_v30  ;;  %vm827_vm10 = vmor %vm825_vm7, %vm826_vm9 }
 0x1cd   : > { %v1518_v6 = vsel %vm1454_vm6, %v1486_v59, 0.0  ;;  %v1235_v16 = vmul.u32 2146121005, %v1203_v41  ;;  %v1095_v26 = vadd.s32 %v1063_v56, %v2368_v0  ;;  %v801_v1 = vand.u32 2147483648, %v3046_v30 }
 0x1ce   : > { %1550 = vst [vmem:[%s2560_s23 + $0x98] sm:$0xff] %v1518_v6  ;;  %v1397_v28 = vxor.u32 %v1365_v29, %v1333_v23  ;;  %v824_v61 = vadd.f32 %v1833_v13, %v823_v39  ;;  %v1003_v44 = vadd.s32 232, %v2344_v37  ;;  %v1493_v43 = vmul.f32 1.1111112, %v966_v3 }
 0x1cf   : > { %v1267_v2 = vshrl.u32 %v1235_v16, 15  ;;  %v1137_v7 = vxor.u32 %v2377_v48, %v1095_v26  ;;  %1836 = vrcp.f32 %v3059_v27  ;;  %v1835_v53 = vpop.eup %1834  ;;  %vm795_vm11 = vweird.f32 %v3046_v30 }
 0x1d0   : > { %v1429_v20 = vshrl.u32 %v1397_v28, 8  ;;  %v828_v49 = vsel %vm827_vm10, %v1833_v13, %v824_v61  ;;  %v1036_v10 = vadd.s32 %v2354_v35, %v1003_v44  ;;  %v791_v51 = vmul.f32 %v1835_v53, %v3046_v30  ;;  %v3085_v13 = vpop.xlane.xlu2 %450 }
 0x1d1   : > { %v1299_v12 = vxor.u32 %v1267_v2, %v1235_v16  ;;  %v833_v15 = vsel %vm3052_vm8, %v832_v33, %v828_v49  ;;  %v1169_v46 = vshrl.u32 %v1137_v7, 16  ;;  %vm3075_vm12 = vcmp.eq.f32.partialorder %v799_v11, 8.507059e+37  ;;  %v3370_v33 = vld [vmem:[#allocation13_spill] sm:$0xff] }
 0x1d2   : > { %vm1461_vm13 = vcmp.ge.s32.totalorder %v1429_v20, 1677722  ;;  %v964_v47 = vmul.f32 %v3367_v50, %v833_v15  ;;  %v802_v24 = vor.u32 1.1754944e-38, %v801_v1  ;;  %v1070_v40 = vmul.u32 128, %v1036_v10 }
 0x1d3   : > { %v1525_v9 = vsel %vm1461_vm13, %v1493_v43, 0.0  ;;  %v1331_v60 = vmul.u32 2221713035, %v1299_v12  ;;  %v1201_v62 = vxor.u32 %v1169_v46, %v1137_v7  ;;  %v792_v55 = vsub.f32 1.0, %v791_v51  ;;  %v3116_v7 = vpop.xlane.xlu0 %446 }
 0x1d4   : > { %1557 = vst [vmem:[%s2560_s23 + $0xd0] sm:$0xff] %v1525_v9  ;;  %vm796_vm14 = vweird.f32 %v1835_v53  ;;  %v1102_v4 = vadd.s32 %v1070_v40, %v2368_v0  ;;  %vm900_vm15 = vweird.f32 %v3059_v27  ;;  %v904_v25 = vand.u32 2147483647, %v3059_v27 }
 0x1d5   : > { %v1837_v38 = vpop.eup %1836  ;;  %v1363_v14 = vshrl.u32 %v1331_v60, 16  ;;  %v1233_v45 = vmul.u32 2146121005, %v1201_v62  ;;  %v793_v18 = vmul.f32 %v1835_v53, %v792_v55  ;;  %v1001_v5 = vadd.s32 216, %v2344_v37  ;;  %vm797_vm1 = vmor %vm795_vm11, %vm796_vm14 }
 0x1d6   : > { %v1491_v32 = vmul.f32 1.1111112, %v964_v47  ;;  %v1144_v34 = vxor.u32 %v2377_v48, %v1102_v4  ;;  %v896_v63 = vmul.f32 %v1837_v38, %v3059_v27  ;;  %v906_v22 = vand.u32 2147483648, %v3059_v27 }
 0x1d7   : > { %v1395_v52 = vxor.u32 %v1363_v14, %v1331_v60  ;;  %v1265_v54 = vshrl.u32 %v1233_v45, 15  ;;  %v794_v19 = vadd.f32 %v1835_v53, %v793_v18  ;;  %vm901_vm0 = vweird.f32 %v1837_v38 }
 0x1d8   : > { %v1176_v31 = vshrl.u32 %v1144_v34, 16  ;;  %v897_v59 = vsub.f32 1.0, %v896_v63  ;;  %v1034_v8 = vadd.s32 %v2354_v35, %v1001_v5  ;;  %1838 = vrcp.f32 %v3085_v13  ;;  %vm3105_vm5 = vmor %vm900_vm15, %vm901_vm0  ;;  %v3130_v4 = vpop.xlane.xlu2 %456 }
 0x1d9   : > { %v1427_v58 = vshrl.u32 %v1395_v52, 8  ;;  %v1297_v36 = vxor.u32 %v1265_v54, %v1233_v45  ;;  %v798_v42 = vsel %vm797_vm1, %v1835_v53, %v794_v19  ;;  %vm3095_vm2 = vcmp.eq.f32.partialorder %v904_v25, 8.507059e+37 }
 0x1da   : > { %v803_v21 = vsel %vm3075_vm12, %v802_v24, %v798_v42  ;;  %v1208_v17 = vxor.u32 %v1176_v31, %v1144_v34  ;;  %v898_v30 = vmul.f32 %v1837_v38, %v897_v59  ;;  %v1068_v3 = vmul.u32 128, %v1034_v8  ;;  %v3373_v24 = vld [vmem:[#allocation17_spill] sm:$0xff] }
 0x1db   : > { %vm1459_vm3 = vcmp.ge.s32.totalorder %v1427_v58, 1677722  ;;  %v1329_v41 = vmul.u32 2221713035, %v1297_v36  ;;  %v962_v56 = vmul.f32 %v3370_v33, %v803_v21  ;;  %v907_v39 = vor.u32 1.1754944e-38, %v906_v22  ;;  %v3382_v21 = vld [vmem:[#allocation20_spill] sm:$0xff] }
 0x1dc   : > { %v1523_v6 = vsel %vm1459_vm3, %v1491_v32, 0.0  ;;  %v1240_v16 = vmul.u32 2146121005, %v1208_v17  ;;  %v899_v26 = vadd.f32 %v1837_v38, %v898_v30  ;;  %v1100_v11 = vadd.s32 %v1068_v3, %v2368_v0  ;;  %v3378_v3 = vld [vmem:[#allocation18_spill] sm:$0xff] }
 0x1dd   : > { %1555 = vst [vmem:[%s2560_s23 + $0xc0] sm:$0xff] %v1523_v6  ;;  %v1361_v28 = vshrl.u32 %v1329_v41, 16  ;;  %v874_v61 = vand.u32 2147483647, %v3085_v13  ;;  %v999_v2 = vadd.s32 200, %v2344_v37  ;;  %vm870_vm7 = vweird.f32 %v3085_v13 }
 0x1de   : > { %v1839_v1 = vpop.eup %1838  ;;  %v1272_v44 = vshrl.u32 %v1240_v16, 15  ;;  %v903_v43 = vsel %vm3105_vm5, %v1837_v38, %v899_v26  ;;  %v1142_v27 = vxor.u32 %v2377_v48, %v1100_v11  ;;  %v1489_v10 = vmul.f32 1.1111112, %v962_v56 }
 0x1df   : > { %v1393_v53 = vxor.u32 %v1361_v28, %v1329_v41  ;;  %v908_v20 = vsel %vm3095_vm2, %v907_v39, %v903_v43  ;;  %v866_v49 = vmul.f32 %v1839_v1, %v3085_v13  ;;  %v876_v46 = vand.u32 2147483648, %v3085_v13 }
 0x1e0   : > { %v1304_v12 = vxor.u32 %v1272_v44, %v1240_v16  ;;  %v1174_v15 = vshrl.u32 %v1142_v27, 16  ;;  %v1032_v50 = vadd.s32 %v2354_v35, %v999_v2  ;;  %1840 = vrcp.f32 %v3116_v7  ;;  %v3153_v16 = vpop.xlane.xlu0 %452 }
 0x1e1   : > { %v1425_v51 = vshrl.u32 %v1393_v53, 8  ;;  %v867_v57 = vsub.f32 1.0, %v866_v49  ;;  %v969_v40 = vmul.f32 %v3373_v24, %v908_v20  ;;  %vm3126_vm4 = vcmp.eq.f32.partialorder %v874_v61, 8.507059e+37 }
 0x1e2   : > { %v1336_v47 = vmul.u32 2221713035, %v1304_v12  ;;  %v1206_v9 = vxor.u32 %v1174_v15, %v1142_v27  ;;  %vm871_vm6 = vweird.f32 %v1839_v1  ;;  %v1066_v55 = vmul.u32 128, %v1032_v50 }
 0x1e3   : > { %vm1457_vm8 = vcmp.ge.s32.totalorder %v1425_v51, 1677722  ;;  %v868_v62 = vmul.f32 %v1839_v1, %v867_v57  ;;  %v877_v45 = vor.u32 1.1754944e-38, %v876_v46  ;;  %v844_v32 = vand.u32 2147483647, %v3116_v7  ;;  %vm872_vm9 = vmor %vm870_vm7, %vm871_vm6 }
 0x1e4   : > { %v1521_v25 = vsel %vm1457_vm8, %v1489_v10, 0.0  ;;  %v1368_v38 = vshrl.u32 %v1336_v47, 16  ;;  %v1238_v14 = vmul.u32 2146121005, %v1206_v9  ;;  %v1098_v5 = vadd.s32 %v1066_v55, %v2368_v0 }
 0x1e5   : > { %1553 = vst [vmem:[%s2560_s23 + $0xb0] sm:$0xff] %v1521_v25  ;;  %v869_v18 = vadd.f32 %v1839_v1, %v868_v62  ;;  %v1004_v34 = vadd.s32 240, %v2344_v37  ;;  %v1496_v22 = vmul.f32 1.1111112, %v969_v40  ;;  %1842 = vrcp.f32 %v3130_v4  ;;  %v3379_v40 = vld [vmem:[#allocation16_spill] sm:$0xff] }
 0x1e6   : > { %v1400_v63 = vxor.u32 %v1368_v38, %v1336_v47  ;;  %v1270_v52 = vshrl.u32 %v1238_v14, 15  ;;  %v1841_v54 = vpop.eup %1840  ;;  %v1140_v31 = vxor.u32 %v2377_v48, %v1098_v5  ;;  %v846_v59 = vand.u32 2147483648, %v3116_v7 }
 0x1e7   : > { %v873_v19 = vsel %vm872_vm9, %v1839_v1, %v869_v18  ;;  %v1037_v8 = vadd.s32 %v2354_v35, %v1004_v34  ;;  %v836_v23 = vmul.f32 %v1841_v54, %v3116_v7  ;;  %vm840_vm10 = vweird.f32 %v3116_v7 }
 0x1e8   : > { %v1432_v58 = vshrl.u32 %v1400_v63, 8  ;;  %v1302_v36 = vxor.u32 %v1270_v52, %v1238_v14  ;;  %v878_v42 = vsel %vm3126_vm4, %v877_v45, %v873_v19  ;;  %v1172_v13 = vshrl.u32 %v1140_v31, 16  ;;  %v3181_v52 = vpop.xlane.xlu0 %458 }
 0x1e9   : > { %vm3147_vm11 = vcmp.eq.f32.partialorder %v844_v32, 8.507059e+37  ;;  %v1071_v17 = vmul.u32 128, %v1037_v8  ;;  %v967_v41 = vmul.f32 %v3378_v3, %v878_v42  ;;  %v837_v33 = vsub.f32 1.0, %v836_v23 }
 0x1ea   : > { %vm1464_vm12 = vcmp.ge.s32.totalorder %v1432_v58, 1677722  ;;  %v1334_v30 = vmul.u32 2221713035, %v1302_v36  ;;  %v1204_v29 = vxor.u32 %v1172_v13, %v1140_v31  ;;  %v847_v39 = vor.u32 1.1754944e-38, %v846_v59 }
 0x1eb   : > { %v1528_v56 = vsel %vm1464_vm12, %v1496_v22, 0.0  ;;  %v1103_v6 = vadd.s32 %v1071_v17, %v2368_v0  ;;  %v1843_v26 = vpop.eup %1842  ;;  %v838_v28 = vmul.f32 %v1841_v54, %v837_v33  ;;  %vm841_vm13 = vweird.f32 %v1841_v54 }
 0x1ec   : > { %1560 = vst [vmem:[%s2560_s23 + $0xe8] sm:$0xff] %v1528_v56  ;;  %v1366_v11 = vshrl.u32 %v1334_v30, 16  ;;  %vm915_vm14 = vweird.f32 %v3130_v4  ;;  %v1236_v61 = vmul.u32 2146121005, %v1204_v29  ;;  %v911_v44 = vmul.f32 %v1843_v26, %v3130_v4  ;;  %vm842_vm15 = vmor %vm840_vm10, %vm841_vm13 }
 0x1ed   : > { %v1145_v1 = vxor.u32 %v2377_v48, %v1103_v6  ;;  %v921_v43 = vand.u32 2147483648, %v3130_v4  ;;  %v1494_v2 = vmul.f32 1.1111112, %v967_v41  ;;  %v839_v53 = vadd.f32 %v1841_v54, %v838_v28 }
 0x1ee   : > { %v1398_v27 = vxor.u32 %v1366_v11, %v1334_v30  ;;  %v1002_v20 = vadd.s32 224, %v2344_v37  ;;  %v1268_v49 = vshrl.u32 %v1236_v61, 15  ;;  %v912_v12 = vsub.f32 1.0, %v911_v44 }
 0x1ef   : > { %v1177_v10 = vshrl.u32 %v1145_v1, 16  ;;  %1844 = vrcp.f32 %v3153_v16  ;;  %v843_v46 = vsel %vm842_vm15, %v1841_v54, %v839_v53  ;;  %vm916_vm0 = vweird.f32 %v1843_v26 }
 0x1f0   : > { %v1430_v15 = vshrl.u32 %v1398_v27, 8  ;;  %v1035_v51 = vadd.s32 %v2354_v35, %v1002_v20  ;;  %v1300_v57 = vxor.u32 %v1268_v49, %v1236_v61  ;;  %v848_v50 = vsel %vm3147_vm11, %v847_v39, %v843_v46  ;;  %vm3173_vm2 = vmor %vm915_vm14, %vm916_vm0  ;;  %v3383_v46 = vld [vmem:[#allocation19_spill] sm:$0xff] }
 0x1f1   : > { %v1209_v47 = vxor.u32 %v1177_v10, %v1145_v1  ;;  %v913_v24 = vmul.f32 %v1843_v26, %v912_v12  ;;  %v965_v7 = vmul.f32 %v3379_v40, %v848_v50  ;;  %v919_v9 = vand.u32 2147483647, %v3130_v4 }
 0x1f2   : > { %vm1462_vm1 = vcmp.ge.s32.totalorder %v1430_v15, 1677722  ;;  %v1069_v60 = vmul.u32 128, %v1035_v51  ;;  %v1332_v55 = vmul.u32 2221713035, %v1300_v57  ;;  %v922_v45 = vor.u32 1.1754944e-38, %v921_v43 }
 0x1f3   : > { %v1526_v62 = vsel %vm1462_vm1, %v1494_v2, 0.0  ;;  %v1241_v25 = vmul.u32 2146121005, %v1209_v47  ;;  %v914_v38 = vadd.f32 %v1843_v26, %v913_v24  ;;  %v1005_v22 = vadd.s32 248, %v2344_v37 }
 0x1f4   : > { %1558 = vst [vmem:[%s2560_s23 + $0xd8] sm:$0xff] %v1526_v62  ;;  %v1101_v18 = vadd.s32 %v1069_v60, %v2368_v0  ;;  %v1364_v32 = vshrl.u32 %v1332_v55, 16  ;;  %vm920_vm3 = vcmp.eq.f32.partialorder %v919_v9, 8.507059e+37  ;;  %v1492_v31 = vmul.f32 1.1111112, %v965_v7 }
 0x1f5   : > { %v1845_v5 = vpop.eup %1844  ;;  %v1273_v34 = vshrl.u32 %v1241_v25, 15  ;;  %v918_v63 = vsel %vm3173_vm2, %v1843_v26, %v914_v38  ;;  %v1038_v42 = vadd.s32 %v2354_v35, %v1005_v22  ;;  %1846 = vrcp.f32 %v3181_v52 }
 0x1f6   : > { %v1143_v4 = vxor.u32 %v2377_v48, %v1101_v18  ;;  %v881_v54 = vmul.f32 %v1845_v5, %v3153_v16  ;;  %v1396_v19 = vxor.u32 %v1364_v32, %v1332_v55  ;;  %v923_v8 = vsel %vm920_vm3, %v922_v45, %v918_v63  ;;  %v3384_v18 = vld [vmem:[#allocation21_spill] sm:$0xff] }
 0x1f7   : > { %v1305_v59 = vxor.u32 %v1273_v34, %v1241_v25  ;;  %vm886_vm5 = vweird.f32 %v1845_v5  ;;  %v891_v13 = vand.u32 2147483648, %v3153_v16  ;;  %v970_v17 = vmul.f32 %v3382_v21, %v923_v8 }
 0x1f8   : > { %v1175_v58 = vshrl.u32 %v1143_v4, 16  ;;  %v882_v36 = vsub.f32 1.0, %v881_v54  ;;  %v1428_v23 = vshrl.u32 %v1396_v19, 8  ;;  %v1072_v41 = vmul.u32 128, %v1038_v42 }
 0x1f9   : > { %v1337_v37 = vmul.u32 2221713035, %v1305_v59  ;;  %vm885_vm4 = vweird.f32 %v3153_v16  ;;  %v889_v56 = vand.u32 2147483647, %v3153_v16  ;;  %v892_v11 = vor.u32 1.1754944e-38, %v891_v13 }
 0x1fa   : > { %v1207_v30 = vxor.u32 %v1175_v58, %v1143_v4  ;;  %v883_v3 = vmul.f32 %v1845_v5, %v882_v36  ;;  %vm1460_vm7 = vcmp.ge.s32.totalorder %v1428_v23, 1677722  ;;  %v1104_v6 = vadd.s32 %v1072_v41, %v2368_v0  ;;  %vm887_vm8 = vmor %vm885_vm4, %vm886_vm5 }
 0x1fb   : > { %v1369_v33 = vshrl.u32 %v1337_v37, 16  ;;  %v1524_v35 = vsel %vm1460_vm7, %v1492_v31, 0.0  ;;  %v1847_v28 = vpop.eup %1846  ;;  %v1497_v61 = vmul.f32 1.1111112, %v970_v17  ;;  %vm890_vm6 = vcmp.eq.f32.partialorder %v889_v56, 8.507059e+37 }
 0x1fc   : > { %v1239_v29 = vmul.u32 2146121005, %v1207_v30  ;;  %v884_v39 = vadd.f32 %v1845_v5, %v883_v3  ;;  %1556 = vst [vmem:[%s2560_s23 + $0xc8] sm:$0xff] %v1524_v35  ;;  %v1146_v43 = vxor.u32 %v2377_v48, %v1104_v6  ;;  %v926_v16 = vmul.f32 %v1847_v28, %v3181_v52 }
 0x1fd   : > { %v1401_v26 = vxor.u32 %v1369_v33, %v1337_v37  ;;  %v936_v15 = vand.u32 2147483648, %v3181_v52  ;;  %vm931_vm10 = vweird.f32 %v1847_v28  ;;  %v934_v48 = vand.u32 2147483647, %v3181_v52 }
 0x1fe   : > { %v1271_v1 = vshrl.u32 %v1239_v29, 15  ;;  %v888_v44 = vsel %vm887_vm8, %v1845_v5, %v884_v39  ;;  %v1178_v20 = vshrl.u32 %v1146_v43, 16  ;;  %v927_v0 = vsub.f32 1.0, %v926_v16 }
 0x1ff   : > { %v1433_v27 = vshrl.u32 %v1401_v26, 8  ;;  %v893_v53 = vsel %vm890_vm6, %v892_v11, %v888_v44  ;;  %vm930_vm11 = vweird.f32 %v3181_v52  ;;  %v937_v9 = vor.u32 1.1754944e-38, %v936_v15 }
 0x200   : > { %v1303_v2 = vxor.u32 %v1271_v1, %v1239_v29  ;;  %v1210_v12 = vxor.u32 %v1178_v20, %v1146_v43  ;;  %v968_v51 = vmul.f32 %v3383_v46, %v893_v53  ;;  %v928_v57 = vmul.f32 %v1847_v28, %v927_v0  ;;  %vm932_vm12 = vmor %vm930_vm11, %vm931_vm10 }
 0x201   : > { %vm1465_vm9 = vcmp.ge.s32.totalorder %v1433_v27, 1677722  ;;  %vm935_vm13 = vcmp.eq.f32.partialorder %v934_v48, 8.507059e+37 }
 0x202   : > { %v1529_v49 = vsel %vm1465_vm9, %v1497_v61, 0.0  ;;  %v1335_v10 = vmul.u32 2221713035, %v1303_v2  ;;  %v1242_v47 = vmul.u32 2146121005, %v1210_v12  ;;  %v929_v24 = vadd.f32 %v1847_v28, %v928_v57 }
 0x203   : > { %1561 = vst [vmem:[%s2560_s23 + $0xf0] sm:$0xff] %v1529_v49  ;;  %v1495_v60 = vmul.f32 1.1111112, %v968_v51 }
 0x204   : > { %v1367_v50 = vshrl.u32 %v1335_v10, 16  ;;  %v1274_v7 = vshrl.u32 %v1242_v47, 15  ;;  %v933_v62 = vsel %vm932_vm12, %v1847_v28, %v929_v24 }
 0x205   : > { %v938_v38 = vsel %vm935_vm13, %v937_v9, %v933_v62 }
 0x206   : > { %v1399_v40 = vxor.u32 %v1367_v50, %v1335_v10  ;;  %v1306_v25 = vxor.u32 %v1274_v7, %v1242_v47  ;;  %v971_v5 = vmul.f32 %v3384_v18, %v938_v38 }
 0x208   : > { %v1431_v55 = vshrl.u32 %v1399_v40, 8  ;;  %v1338_v14 = vmul.u32 2221713035, %v1306_v25  ;;  %v1498_v63 = vmul.f32 1.1111112, %v971_v5 }
 0x20a   : > { %vm1463_vm14 = vcmp.ge.s32.totalorder %v1431_v55, 1677722  ;;  %v1370_v32 = vshrl.u32 %v1338_v14, 16 }
 0x20b   : > { %v1527_v45 = vsel %vm1463_vm14, %v1495_v60, 0.0 }
 0x20c   : > { %1559 = vst [vmem:[%s2560_s23 + $0xe0] sm:$0xff] %v1527_v45  ;;  %v1402_v34 = vxor.u32 %v1370_v32, %v1338_v14 }
 0x20e   : > { %v1434_v22 = vshrl.u32 %v1402_v34, 8 }
 0x210   : > { %vm1466_vm15 = vcmp.ge.s32.totalorder %v1434_v22, 1677722 }
 0x211   : > { %v1530_v52 = vsel %vm1466_vm15, %v1498_v63, 0.0 }
 0x212   : > { %1562 = vst [vmem:[%s2560_s23 + $0xf8] sm:$0xff] %v1530_v52 }
 0x213   : > { %1905 = shalt.err (!%p1902_p4)
}
 0x214   : > { %s1948_s29 = smov 128   ;;  %s1949_s12 = smov 8  }
 0x215   : > { %1671 = dma.vmem_to_hbm [thread:$0]  (%p2023_p11), %s1577_s4, 4096, %s1579_s5, %s1564_s6, %s1948_s29, %s1948_s29, %s1949_s12  }
 0x216 PF: > { %s1593_s13 = sand.u32 1, %s1932_s14   ;;  %p3385_p7 = scmp.ge.s32.totalorder %s1944_s17, 2 }
 0x217   : > { %s1594_s18 = scalar_lea.sflag [#allocation6], %s1593_s13 }
 0x218   : > { %p1678_p5 = pnand %p3385_p7, %p2027_p12 }
 0x21a   : > { %p1679_p8 = pneg %p1678_p5 }
 0x21c   : > { %1927 = dma.done.wait (%p1679_p8), %s1594_s18, 4096  }
 0x21d   : > { %1929 = vsyncadd (%p1679_p8), %s1594_s18, 4294963200  ;;  %p17_p10 = scmp.ge.s32.totalorder %s1998_s19, 4   ;;  %s3386_s14 = smov %s1936_s15 }
 0x21e   : > { %s3387_s15 = smov %s1940_s16  ;;  %s3388_s16 = smov %s2010_s22 }
 0x21f   : > { %s3389_s17 = smov %s1998_s19  ;;  %19 = sbr.rel (!%p17_p10) target bundleno = 7 (0x7), region = 73 }
 0x224   :  { %1600 = vsyncpa [#allocation5], 1 }
 0x225   :  { %1602 = vsyncpa [#allocation5 + $0x1], 1 }
 0x226   :  { %1603 = vsyncpa [#allocation6], 1 }
 0x227   :  { %1605 = vsyncpa [#allocation6 + $0x1], 1 }

</bundles_post_ra>
